<compile_context>
chip_gen: v6e
topology: v6e:2x2x1
jax: 0.10.0
libtpu: 0.0.40
codegen_flags: <defaults>
</compile_context>

<pallas_src>
import functools
import math

import jax
import jax.numpy as jnp
from jax.experimental import pallas as pl
from jax.experimental.pallas import tpu as pltpu

_SUBLANE = 16   # bf16 sublane packing: keep batch-tile rows a multiple of 16
_LANE = 128


def _round_up(x, m):
    return ((x + m - 1) // m) * m


def _cdiv(a, b):
    return -(-a // b)


def _mlp_kernel(num_layers, *refs):
    """Fused MLP forward on one batch tile.

    refs = (x_ref, w1, b1, w2, b2, ..., wL, bL, out_ref)
    Hidden layers: bf16 MXU matmul (fp32 accum) -> bf16 bias add + ReLU (VPU).
    Final layer:   bf16 MXU matmul, fp32 accum + fp32 bias, bf16 lane-dense store.
    Weights/biases have constant index_maps -> VMEM-resident across the grid.
    """
    x_ref = refs[0]
    out_ref = refs[-1]
    p = refs[1:-1]

    h = x_ref[...]                                   # bf16 (tb, in_dim)
    for layer in range(num_layers - 1):
        w = p[2 * layer][...]                        # bf16 (in, out)
        b = p[2 * layer + 1][...]                    # bf16 (1, out)
        y = jnp.dot(h, w, preferred_element_type=jnp.float32)    # MXU
        h = jnp.maximum(y.astype(jnp.bfloat16) + b, 0.0)          # bf16 VPU

    w = p[2 * (num_layers - 1)][...]                 # bf16 (256, out_pad)
    b = p[2 * (num_layers - 1) + 1][...]             # f32  (1, out_pad)
    y = jnp.dot(h, w, preferred_element_type=jnp.float32) + b
    out_ref[...] = y.astype(out_ref.dtype)           # unmasked lane-dense vst


def network_forward(x, kernel_params, output_dim, *, num_tiles=None,
                    max_tile_rows=1024):
    """Run the fused MLP.

    kernel_params: list of (W[in,out], b[1,out]); W bf16, hidden b bf16,
    final layer lane-padded to a multiple of 128 columns with f32 bias.
    """
    batch, in_dim = x.shape
    num_layers = len(kernel_params)
    out_pad = kernel_params[-1][0].shape[1]          # lane-dense output width

    # --- tiling policy -----------------------------------------------------
    # >=2 tiles so dimension_semantics=("parallel",) can shard the batch over
    # both TensorCores on v7x; the extra grid step costs ~0.35us on single-TC
    # v5e/v6e, which is negligible.  Tile rows derived from the actual batch
    # (multiple of 16 for bf16), capped at max_tile_rows for very large batches.
    if num_tiles is None:
        num_tiles = 2 if batch >= 2 * _SUBLANE else 1
    num_tiles = max(num_tiles, _cdiv(batch, max_tile_rows))
    tb = _round_up(_cdiv(batch, num_tiles), _SUBLANE)
    grid = _cdiv(batch, tb)
    padded_batch = grid * tb                         # tiny pad (< num_tiles*16 rows)

    x = x.astype(jnp.bfloat16)                       # half-width x DMA
    if padded_batch != batch:
        x = jnp.pad(x, ((0, padded_batch - batch), (0, 0)))

    flat_inputs = [x]
    in_specs = [pl.BlockSpec((tb, in_dim), lambda i: (i, 0))]
    for (w, b) in kernel_params:
        flat_inputs.extend([w, b])
        # Constant block index -> weights/biases stay resident, no re-DMA.
        in_specs.append(pl.BlockSpec(w.shape, lambda i: (0, 0)))
        in_specs.append(pl.BlockSpec(b.shape, lambda i: (0, 0)))

    flops = 2 * padded_batch * sum(int(w.shape[0]) * int(w.shape[1])
                                   for w, _ in kernel_params)
    bytes_accessed = (int(x.size) * x.dtype.itemsize
                      + sum(int(w.size) * w.dtype.itemsize
                            + int(b.size) * b.dtype.itemsize
                            for w, b in kernel_params)
                      + padded_batch * out_pad * 2)          # bf16 output

    out = pl.pallas_call(
        functools.partial(_mlp_kernel, num_layers),
        out_shape=jax.ShapeDtypeStruct((padded_batch, out_pad), jnp.bfloat16),
        grid=(grid,),
        in_specs=in_specs,
        out_specs=pl.BlockSpec((tb, out_pad), lambda i: (i, 0)),
        compiler_params=pltpu.CompilerParams(
            dimension_semantics=("parallel",),       # shard batch tiles over TCs
            vmem_limit_bytes=32 * 1024 * 1024,       # well under v7x's 64 MiB
        ),
        cost_estimate=pl.CostEstimate(flops=flops, transcendentals=0,
                                      bytes_accessed=bytes_accessed),
    )(*flat_inputs)

    return out[:batch, :output_dim].astype(jnp.float32)


def init_network_params(key, input_dim, output_dim, n_hidden_layers, hidden=256):
    """fp32 params matching PyTorch nn.Linear default init, W stored (in, out)."""
    dims = [input_dim] + [hidden] * (n_hidden_layers + 1) + [output_dim]
    params = []
    for i in range(len(dims) - 1):
        fan_in, fan_out = dims[i], dims[i + 1]
        key, kw, kb = jax.random.split(key, 3)
        bound = 1.0 / math.sqrt(fan_in)
        w = jax.random.uniform(kw, (fan_in, fan_out), jnp.float32, -bound, bound)
        b = jax.random.uniform(kb, (1, fan_out), jnp.float32, -bound, bound)
        params.append((w, b))
    return params


def prepare_kernel_params(params_f32):
    """bf16 weights for the MXU; bf16 hidden biases (bf16 VPU path);
    last layer zero-padded to a lane-dense width with an f32 bias."""
    kparams = []
    n = len(params_f32)
    for i, (w, b) in enumerate(params_f32):
        if i == n - 1:
            out_dim = w.shape[1]
            out_padded = _round_up(out_dim, _LANE)
            if out_padded != out_dim:
                w = jnp.pad(w, ((0, 0), (0, out_padded - out_dim)))
                b = jnp.pad(b, ((0, 0), (0, out_padded - out_dim)))
            kparams.append((w.astype(jnp.bfloat16), b.astype(jnp.float32)))
        else:
            kparams.append((w.astype(jnp.bfloat16), b.astype(jnp.bfloat16)))
    return kparams


def network_reference(x, params_f32):
    """Pure fp32 JAX reference (matches the PyTorch forward)."""
    h = x.astype(jnp.float32)
    n = len(params_f32)
    for i, (w, b) in enumerate(params_f32):
        h = h @ w + b
        if i < n - 1:
            h = jnp.maximum(h, 0.0)
    return h


# TODO(synk): `load_parameters` (state_dict copy) is host-side bookkeeping with
# no Pallas equivalent; re-run prepare_kernel_params on copied fp32 params.

if __name__ == "__main__":
    input_dim = 12
    output_dim = 4
    n_hidden_layers = 2
    batch = 300          # non-multiple of the tile -> exercises pad + multi-tile grid

    key = jax.random.PRNGKey(0)
    kx, kp, kx2 = jax.random.split(key, 3)
    x = jax.random.normal(kx, (batch, input_dim), jnp.float32)

    params_f32 = init_network_params(kp, input_dim, output_dim, n_hidden_layers)
    kernel_params = prepare_kernel_params(params_f32)

    out = network_forward(x, kernel_params, output_dim)
    out = jax.block_until_ready(out)

    ref = network_reference(x, params_f32)
    assert out.shape == (batch, output_dim), out.shape
    # bf16 weights/activations (fp32 accumulation) vs pure fp32 reference.
    max_diff = float(jnp.max(jnp.abs(out - ref)))
    assert jnp.allclose(out, ref, atol=3e-2, rtol=3e-2), f"max abs diff = {max_diff}"

    # Tiny-batch path (single tile, rows rounded to 16).
    x2 = jax.random.normal(kx2, (5, input_dim), jnp.float32)
    out2 = jax.block_until_ready(network_forward(x2, kernel_params, output_dim))
    ref2 = network_reference(x2, params_f32)
    assert out2.shape == (5, output_dim), out2.shape
    assert jnp.allclose(out2, ref2, atol=3e-2, rtol=3e-2)

    print("KERNEL_OK")
</pallas_src>

<mosaic_0001>
module attributes {stable_mosaic.version = 11 : i64} {
  func.func @_mlp_kernel(%arg0: i32, %arg1: memref<160x12xbf16, #tpu.memory_space<vmem>>, %arg2: memref<12x256xbf16, #tpu.memory_space<vmem>>, %arg3: memref<1x256xbf16, #tpu.memory_space<vmem>>, %arg4: memref<256x256xbf16, #tpu.memory_space<vmem>>, %arg5: memref<1x256xbf16, #tpu.memory_space<vmem>>, %arg6: memref<256x256xbf16, #tpu.memory_space<vmem>>, %arg7: memref<1x256xbf16, #tpu.memory_space<vmem>>, %arg8: memref<256x128xbf16, #tpu.memory_space<vmem>>, %arg9: memref<1x128xf32, #tpu.memory_space<vmem>>, %arg10: memref<160x128xbf16, #tpu.memory_space<vmem>>) attributes {dimension_semantics = [#tpu.dimension_semantics<parallel>], iteration_bounds = array<i64: 2>, scalar_prefetch = 0 : i64, scratch_operands = 0 : i64, tpu.core_type = #tpu.core_type<tc>, window_params = [{transform_indices = @transform_0, window_bounds = array<i64: 160, 12>}, {pipeline_mode = #tpu.pipeline_mode<synchronous>, transform_indices = @transform_1, window_bounds = array<i64: 12, 256>}, {pipeline_mode = #tpu.pipeline_mode<synchronous>, transform_indices = @transform_2, window_bounds = array<i64: 1, 256>}, {pipeline_mode = #tpu.pipeline_mode<synchronous>, transform_indices = @transform_3, window_bounds = array<i64: 256, 256>}, {pipeline_mode = #tpu.pipeline_mode<synchronous>, transform_indices = @transform_4, window_bounds = array<i64: 1, 256>}, {pipeline_mode = #tpu.pipeline_mode<synchronous>, transform_indices = @transform_5, window_bounds = array<i64: 256, 256>}, {pipeline_mode = #tpu.pipeline_mode<synchronous>, transform_indices = @transform_6, window_bounds = array<i64: 1, 256>}, {pipeline_mode = #tpu.pipeline_mode<synchronous>, transform_indices = @transform_7, window_bounds = array<i64: 256, 128>}, {pipeline_mode = #tpu.pipeline_mode<synchronous>, transform_indices = @transform_8, window_bounds = array<i64: 1, 128>}, {transform_indices = @transform_9, window_bounds = array<i64: 160, 128>}]} {
    %c0 = arith.constant 0 : index
    %c0_0 = arith.constant 0 : index
    %0 = vector.load %arg1[%c0, %c0_0] : memref<160x12xbf16, #tpu.memory_space<vmem>>, vector<160x12xbf16>
    %c0_1 = arith.constant 0 : index
    %c0_2 = arith.constant 0 : index
    %1 = vector.load %arg2[%c0_1, %c0_2] : memref<12x256xbf16, #tpu.memory_space<vmem>>, vector<12x256xbf16>
    %c0_3 = arith.constant 0 : index
    %c0_4 = arith.constant 0 : index
    %2 = vector.load %arg3[%c0_3, %c0_4] : memref<1x256xbf16, #tpu.memory_space<vmem>>, vector<1x256xbf16>
    %cst = arith.constant dense<0.000000e+00> : vector<160x256xf32>
    %3 = tpu.matmul %0, %1, %cst {dimension_numbers = #tpu.dot_dimension_numbers<[1], [0], [0], [1], [0, 0, 1, 1], [], []>} : vector<160x12xbf16>, vector<12x256xbf16>, vector<160x256xf32> -> vector<160x256xf32>
    %4 = arith.truncf %3 : vector<160x256xf32> to vector<160x256xbf16>
    %5 = vector.broadcast %2 : vector<1x256xbf16> to vector<160x256xbf16>
    %6 = arith.addf %4, %5 : vector<160x256xbf16>
    %cst_5 = arith.constant 0.000000e+00 : bf16
    %7 = vector.broadcast %cst_5 : bf16 to vector<160x256xbf16>
    %8 = arith.maximumf %6, %7 : vector<160x256xbf16>
    %c0_6 = arith.constant 0 : index
    %c0_7 = arith.constant 0 : index
    %9 = vector.load %arg4[%c0_6, %c0_7] : memref<256x256xbf16, #tpu.memory_space<vmem>>, vector<256x256xbf16>
    %c0_8 = arith.constant 0 : index
    %c0_9 = arith.constant 0 : index
    %10 = vector.load %arg5[%c0_8, %c0_9] : memref<1x256xbf16, #tpu.memory_space<vmem>>, vector<1x256xbf16>
    %cst_10 = arith.constant dense<0.000000e+00> : vector<160x256xf32>
    %11 = tpu.matmul %8, %9, %cst_10 {dimension_numbers = #tpu.dot_dimension_numbers<[1], [0], [0], [1], [0, 0, 1, 1], [], []>} : vector<160x256xbf16>, vector<256x256xbf16>, vector<160x256xf32> -> vector<160x256xf32>
    %12 = arith.truncf %11 : vector<160x256xf32> to vector<160x256xbf16>
    %13 = vector.broadcast %10 : vector<1x256xbf16> to vector<160x256xbf16>
    %14 = arith.addf %12, %13 : vector<160x256xbf16>
    %cst_11 = arith.constant 0.000000e+00 : bf16
    %15 = vector.broadcast %cst_11 : bf16 to vector<160x256xbf16>
    %16 = arith.maximumf %14, %15 : vector<160x256xbf16>
    %c0_12 = arith.constant 0 : index
    %c0_13 = arith.constant 0 : index
    %17 = vector.load %arg6[%c0_12, %c0_13] : memref<256x256xbf16, #tpu.memory_space<vmem>>, vector<256x256xbf16>
    %c0_14 = arith.constant 0 : index
    %c0_15 = arith.constant 0 : index
    %18 = vector.load %arg7[%c0_14, %c0_15] : memref<1x256xbf16, #tpu.memory_space<vmem>>, vector<1x256xbf16>
    %cst_16 = arith.constant dense<0.000000e+00> : vector<160x256xf32>
    %19 = tpu.matmul %16, %17, %cst_16 {dimension_numbers = #tpu.dot_dimension_numbers<[1], [0], [0], [1], [0, 0, 1, 1], [], []>} : vector<160x256xbf16>, vector<256x256xbf16>, vector<160x256xf32> -> vector<160x256xf32>
    %20 = arith.truncf %19 : vector<160x256xf32> to vector<160x256xbf16>
    %21 = vector.broadcast %18 : vector<1x256xbf16> to vector<160x256xbf16>
    %22 = arith.addf %20, %21 : vector<160x256xbf16>
    %cst_17 = arith.constant 0.000000e+00 : bf16
    %23 = vector.broadcast %cst_17 : bf16 to vector<160x256xbf16>
    %24 = arith.maximumf %22, %23 : vector<160x256xbf16>
    %c0_18 = arith.constant 0 : index
    %c0_19 = arith.constant 0 : index
    %25 = vector.load %arg8[%c0_18, %c0_19] : memref<256x128xbf16, #tpu.memory_space<vmem>>, vector<256x128xbf16>
    %c0_20 = arith.constant 0 : index
    %c0_21 = arith.constant 0 : index
    %26 = vector.load %arg9[%c0_20, %c0_21] : memref<1x128xf32, #tpu.memory_space<vmem>>, vector<1x128xf32>
    %cst_22 = arith.constant dense<0.000000e+00> : vector<160x128xf32>
    %27 = tpu.matmul %24, %25, %cst_22 {dimension_numbers = #tpu.dot_dimension_numbers<[1], [0], [0], [1], [0, 0, 1, 1], [], []>} : vector<160x256xbf16>, vector<256x128xbf16>, vector<160x128xf32> -> vector<160x128xf32>
    %28 = vector.broadcast %26 : vector<1x128xf32> to vector<160x128xf32>
    %29 = arith.addf %27, %28 : vector<160x128xf32>
    %30 = arith.truncf %29 : vector<160x128xf32> to vector<160x128xbf16>
    %c0_23 = arith.constant 0 : index
    %c0_24 = arith.constant 0 : index
    %31 = vector.load %arg10[%c0_23, %c0_24] : memref<160x128xbf16, #tpu.memory_space<vmem>>, vector<160x128xbf16>
    tpu.vector_store %arg10[%c0_23, %c0_24], %30 {strides = array<i32>} : memref<160x128xbf16, #tpu.memory_space<vmem>>, vector<160x128xbf16>,
    return
  }
  func.func @transform_0(%arg0: i32) -> (i32, i32) {
    %c0_i32 = arith.constant 0 : i32
    %c0_i32_0 = arith.constant 0 : i32
    return %arg0, %c0_i32 : i32, i32
  }
  func.func @transform_1(%arg0: i32) -> (i32, i32) {
    %c0_i32 = arith.constant 0 : i32
    %c0_i32_0 = arith.constant 0 : i32
    %c0_i32_1 = arith.constant 0 : i32
    return %c0_i32, %c0_i32_0 : i32, i32
  }
  func.func @transform_2(%arg0: i32) -> (i32, i32) {
    %c0_i32 = arith.constant 0 : i32
    %c0_i32_0 = arith.constant 0 : i32
    %c0_i32_1 = arith.constant 0 : i32
    return %c0_i32, %c0_i32_0 : i32, i32
  }
  func.func @transform_3(%arg0: i32) -> (i32, i32) {
    %c0_i32 = arith.constant 0 : i32
    %c0_i32_0 = arith.constant 0 : i32
    %c0_i32_1 = arith.constant 0 : i32
    return %c0_i32, %c0_i32_0 : i32, i32
  }
  func.func @transform_4(%arg0: i32) -> (i32, i32) {
    %c0_i32 = arith.constant 0 : i32
    %c0_i32_0 = arith.constant 0 : i32
    %c0_i32_1 = arith.constant 0 : i32
    return %c0_i32, %c0_i32_0 : i32, i32
  }
  func.func @transform_5(%arg0: i32) -> (i32, i32) {
    %c0_i32 = arith.constant 0 : i32
    %c0_i32_0 = arith.constant 0 : i32
    %c0_i32_1 = arith.constant 0 : i32
    return %c0_i32, %c0_i32_0 : i32, i32
  }
  func.func @transform_6(%arg0: i32) -> (i32, i32) {
    %c0_i32 = arith.constant 0 : i32
    %c0_i32_0 = arith.constant 0 : i32
    %c0_i32_1 = arith.constant 0 : i32
    return %c0_i32, %c0_i32_0 : i32, i32
  }
  func.func @transform_7(%arg0: i32) -> (i32, i32) {
    %c0_i32 = arith.constant 0 : i32
    %c0_i32_0 = arith.constant 0 : i32
    %c0_i32_1 = arith.constant 0 : i32
    return %c0_i32, %c0_i32_0 : i32, i32
  }
  func.func @transform_8(%arg0: i32) -> (i32, i32) {
    %c0_i32 = arith.constant 0 : i32
    %c0_i32_0 = arith.constant 0 : i32
    %c0_i32_1 = arith.constant 0 : i32
    return %c0_i32, %c0_i32_0 : i32, i32
  }
  func.func @transform_9(%arg0: i32) -> (i32, i32) {
    %c0_i32 = arith.constant 0 : i32
    %c0_i32_0 = arith.constant 0 : i32
    return %arg0, %c0_i32 : i32, i32
  }
}

</mosaic_0001>

<bundles_post_ra>
// kernel: tpu_custom_call.1
= control target key start
LH: loop header
LB: loop body
LE: loop exit
PB: predicated region body
PF: predicated region fallthrough
CT: control target
= control target key end

     0   :  { %14 = vsyncpa [#allocation3], 0  ;;  %s3117_s0 = inlined_call_operand.vmem [shape: bf16[320,12], index: 0, kind: input, shape index: {}]   ;;  %s3118_s1 = inlined_call_operand.vmem [shape: bf16[12,256], index: 1, kind: input, shape index: {}]   ;;  %s3119_s2 = inlined_call_operand.vmem [shape: bf16[1,256], index: 2, kind: input, shape index: {}]   ;;  %s3120_s3 = inlined_call_operand.hbm [shape: bf16[256,256], index: 3, kind: input, shape index: {}]   ;;  %s3121_s4 = inlined_call_operand.vmem [shape: bf16[1,256], index: 4, kind: input, shape index: {}]   ;;  %s3122_s5 = inlined_call_operand.hbm [shape: bf16[256,256], index: 5, kind: input, shape index: {}]   ;;  %s3123_s6 = inlined_call_operand.vmem [shape: bf16[1,256], index: 6, kind: input, shape index: {}]   ;;  %s3124_s7 = inlined_call_operand.vmem [shape: bf16[256,128], index: 7, kind: input, shape index: {}]   ;;  %s3125_s8 = inlined_call_operand.vmem [shape: f32[1,128], index: 8, kind: input, shape index: {}]   ;;  %s3126_s9 = inlined_call_operand.hbm [shape: bf16[320,128], index: 9, kind: output, shape index: {}]  }
   0x1   :  { %15 = vsyncpa [#allocation6], 0 }
   0x2   :  { %16 = vsyncpa [#allocation4], 0 }
   0x3   :  { %18 = vsyncpa [#allocation4 + $0x1], 0  ;;  %s2690_s30 = smov 0   ;;  %s2692_s10 = smov 0  }
   0x4   :  { %s2694_s11 = smov 0   ;;  %s2696_s12 = smov 0  }
   0x5 LB: > { %s2711_s13 = sadd.s32 4294967295, %s2629_s12   ;;  %s2006_s14 = sadd.s32 4294967294, %s2629_s12   ;;  %s2629_s12 = sphi %s2696_s12, %s3140_s12   ;;  %s2625_s11 = sphi %s2694_s11, %s3139_s11   ;;  %s2621_s10 = sphi %s2692_s10, %s3138_s10   ;;  %s2617_s30 = sphi %s2690_s30, %s3137_s30  }
   0x6   : > { %s2715_s15 = sadd.s32 1, %s2629_s12   ;;  %s225_s16 = sadd.s32 1, %s2625_s11 }
   0x7   : > { %s222_s17 = ssub.s32 %s2629_s12, %s2715_s15  ;;  %p235_p0 = scmp.ne.s32.totalorder %s2625_s11, %s2621_s10 }
   0x8   : > { %p223_p1 = scmp.eq.s32.totalorder %s222_s17, 0  ;;  %p236_p2 = scmp.eq.s32.totalorder %s2711_s13, 1 }
   0x9   : > { %p241_p3 = scmp.ne.s32.totalorder %s2621_s10, %s2617_s30  ;;  %p242_p4 = scmp.eq.s32.totalorder %s2006_s14, 1 }
   0xa   : > { %s2726_s18 = scalar_select %p223_p1, %s2625_s11, %s225_s16  }
   0xb   : > { %p2728_p5 = por %p236_p2, %p235_p0  ;;  %p2732_p6 = por %p242_p4, %p241_p3 }
   0xc   : > { %p2007_p7 = scmp.ge.s32.totalorder %s2629_s12, 1  ;;  %p249_p8 = scmp.lt.s32.totalorder %s2629_s12, 3 }
   0xd   : > { %s3129_s20 = scalar_select %p2732_p6, 1, 0 }
   0xe   : > { %p3127_p9 = scmp.eq.s32.totalorder %s2711_s13, 0  ;;  %p2739_p10 = pnand %p2007_p7, %p249_p8 }
   0xf   : > { %s2631_s22 = smov [#allocation2]   ;;  %s2632_s25 = smov [#allocation5]  }
  0x10   : > { %s267_s23 = sshll.u32 %s2631_s22, 4  ;;  %p2328_p11 = pneg %p2739_p10  ;;  %s268_s23 = int_to_ptr.vmem [resolvable:$true] %s267_s23 }
  0x11   : > { %s283_s26 = sshll.u32 %s2632_s25, 4  ;;  %s2520_s27 = scalar_lea.vmem %s268_s23, 4096  ;;  %s284_s26 = int_to_ptr.vmem [resolvable:$true] %s283_s26 }
  0x12   : > { %p2747_p12 = pnand %p3127_p9, %p2328_p11  ;;  %p2521_p0 = scmp.ne.s32.totalorder %s268_s23, %s2520_s27 }
  0x13   : > { %p2528_p3 = scmp.lt.s32.totalorder %s268_s23, %s268_s23  ;;  %p2529_p4 = scmp.lt.s32.totalorder %s2520_s27, %s2520_s27 }
  0x14   : > { %p2511_p13 = pneg %p2747_p12 }
  0x15   : > { %p2530_p7 = por %p2529_p4, %p2528_p3 }
  0x16   : > { %p2523_p1 = pnand %p2521_p0, %p2511_p13 }
  0x18   : > { %p2524_p2 = pneg %p2523_p1 }
  0x1a   : > { %p2531_p8 = pnand %p2530_p7, %p2524_p2 }
  0x1c   : > { %2534 = shalt.err (!%p2531_p8)
}
  0x1d   : > { %s2633_s28 = smov 128   ;;  %s2634_s29 = smov 8  }
  0x1e   : > { %2331 = dma.hbm_to_vmem [thread:$0]  (!%p2747_p12), %s3120_s3, 4096, %s268_s23, [#allocation3], %s2633_s28, %s2633_s28, %s2634_s29  }
  0x1f   : > { %s2546_s17 = scalar_lea.vmem %s284_s26, 4096  ;;  %p2554_p9 = scmp.lt.s32.totalorder %s284_s26, %s284_s26 }
  0x20   : > { %p2547_p11 = scmp.ne.s32.totalorder %s284_s26, %s2546_s17  ;;  %p2555_p6 = scmp.lt.s32.totalorder %s2546_s17, %s2546_s17 }
  0x22   : > { %p2549_p0 = pnand %p2547_p11, %p2511_p13  ;;  %p2556_p3 = por %p2555_p6, %p2554_p9 }
  0x24   : > { %p2550_p1 = pneg %p2549_p0 }
  0x26   : > { %p2557_p2 = pnand %p2556_p3, %p2550_p1 }
  0x28   : > { %2560 = shalt.err (!%p2557_p2)
}
  0x29   : > { %2334 = dma.hbm_to_vmem [thread:$0]  (!%p2747_p12), %s3122_s5, 4096, %s284_s26, [#allocation6], %s2633_s28, %s2633_s28, %s2634_s29  }
  0x2a   : > { %317 = sbr.rel (%p2739_p10) target bundleno = 968 (0x3c8), region = 56  ;;  %p3132_p4 = scmp.eq.s32.totalorder (!%p2739_p10), %s2711_s13, 0 }
  0x2f   : > { %2604 = dma.done.wait (%p3132_p4), [#allocation3], 4096   ;;  %p3133_p13 = pmov %p3132_p4 }
  0x30   : > { %p3134_p7 = pmov %p3132_p4 }
  0x31   : > { %2606 = vsyncadd (%p3133_p13), [#allocation3], 4294963200 }
  0x32   : > { %2608 = dma.done.wait (%p3134_p7), [#allocation6], 4096   ;;  %p3135_p6 = pmov %p3132_p4 }
  0x33   : > { %s357_s23 = smul.u32 20, %s2711_s13  ;;  %v2635_v0 = vmov 0   ;;  %vm477_vm0 = vcmask 1045504   ;;  %v2384_v1 = vld [vmem:[%s3118_s1 + $0x4] ss:$8 sps:$4 sm:$0x3f]   ;;  %v649_v63 = vlaneseq }
  0x34   : > { %2610 = vsyncadd (%p3135_p6), [#allocation6], 4294963200  ;;  %516 = vmatprep.mubr.bf16.mxu0 %v2635_v0  ;;  %v2386_v2 = vld [vmem:[%s3118_s1] ss:$8 sps:$4 sm:$0x3f]   ;;  %2027 = vmatprep.subr.msk.bf16.mxu0 %vm477_vm0, %v2384_v1  ;;  %vm446_vm1 = vcmask 97280  }
  0x35   : > { %p358_p9 = scmp.lt.s32.totalorder %s357_s23, 39  ;;  %v479_v3 = vsel %vm477_vm0, %v2386_v2, 0  ;;  %v2397_v6 = vld [vmem:[#allocation2 + $0x74] ss:$8 sps:$4 sm:$0xff]   ;;  %v2399_v7 = vld [vmem:[#allocation2 + $0x70] ss:$8 sps:$4 sm:$0xff]  }
  0x36   : > { %499 = vmatpush1.bf16.msra.mxu0 %v479_v3  ;;  %v2400_v8 = vld [vmem:[#allocation2 + $0x64] ss:$8 sps:$4 sm:$0xff]   ;;  %907 = vmatprep.subr.bf16.mxu1 %v2397_v6  ;;  %v2402_v9 = vld [vmem:[#allocation2 + $0x60] ss:$8 sps:$4 sm:$0xff]   ;;  %v2403_v10 = vld [vmem:[#allocation2 + $0x54] ss:$8 sps:$4 sm:$0xff]  }
  0x37   : > { %s3142_s23 = smov (!%p358_p9, %s357_s23), 39  ;;  %908 = vmatpush1.bf16.msra.mxu1 %v2399_v7  ;;  %v2405_v12 = vld [vmem:[#allocation2 + $0x50] ss:$8 sps:$4 sm:$0xff]   ;;  %v2406_v13 = vld [vmem:[#allocation2 + $0x44] ss:$8 sps:$4 sm:$0xff]   ;;  %s354_s25 = sand.u32 1, %s2621_s10  }
  0x38   : > { %s2014_s21 = sshll.u32 %s3142_s23, 2  ;;  %909 = vmatprep.subr.bf16.mxu1 %v2400_v8  ;;  %v2408_v14 = vld [vmem:[#allocation2 + $0x40] ss:$8 sps:$4 sm:$0xff]   ;;  %v2409_v15 = vld [vmem:[#allocation2 + $0x34] ss:$8 sps:$4 sm:$0xff]   ;;  %s2317_s24 = smul.u32 80, %s354_s25 }
  0x39   : > { %s2787_s29 = scalar_lea.vmem %s3117_s0, %s2014_s21  ;;  %v2411_v17 = vld [vmem:[#allocation2 + $0x30] ss:$8 sps:$4 sm:$0xff]   ;;  %v2412_v18 = vld [vmem:[#allocation2 + $0x24] ss:$8 sps:$4 sm:$0xff]   ;;  %v2414_v19 = vld [vmem:[#allocation2 + $0x20] ss:$8 sps:$4 sm:$0xff]  }
  0x3a   : > { %v2387_v4 = vld [vmem:[%s2787_s29] sm:$0xff]   ;;  %v2388_v5 = vld [vmem:[%s2787_s29 + $0x8] sm:$0xff]   ;;  %v2389_v11 = vld [vmem:[%s2787_s29 + $0x10] sm:$0xff]   ;;  %v2636_v61 = vmov 1966171168   ;;  %s3036_s26 = scalar_lea.vmem [#allocation7], %s2317_s24 }
  0x3b   : > { %2028 = vmatmul.mubr.msk.bf16.vlgmr.msra.gmra.mxu0 %vm446_vm1, %v2387_v4  ;;  %910 = vmatpush1.bf16.msra.mxu1 %v2402_v9  ;;  %v2390_v16 = vld [vmem:[%s2787_s29 + $0x18] sm:$0xff]   ;;  %v2391_v21 = vld [vmem:[%s2787_s29 + $0x20] sm:$0xff]   ;;  %v2392_v26 = vld [vmem:[%s2787_s29 + $0x28] sm:$0xff]   ;;  %v647_v62 = vunpack.c.l.s4 %v2636_v61  ;;  %v650_v4 = vshrl.u32 %v649_v63, 7  ;;  %s2165_s27 = smul.u32 1280, %s2711_s13  ;;  %s1922_s28 = sshll.u32 %s3036_s26, 4  ;;  %s3072_s28 = int_to_ptr.vmem [resolvable:$true] %s1922_s28 }
  0x3c   : > { %526 = vmatprep.mubr.bf16.mxu0 %v2635_v0  ;;  %911 = vmatprep.subr.bf16.mxu1 %v2403_v10  ;;  %v2415_v20 = vld [vmem:[#allocation2 + $0x14] ss:$8 sps:$4 sm:$0xff]   ;;  %v2417_v22 = vld [vmem:[#allocation2 + $0x10] ss:$8 sps:$4 sm:$0xff]   ;;  %v2418_v23 = vld [vmem:[#allocation2 + $0x4] ss:$8 sps:$4 sm:$0xff]  }
  0x3d   : > { %v2420_v24 = vld [vmem:[#allocation2] ss:$8 sps:$4 sm:$0xff]   ;;  %v2421_v25 = vld [vmem:[#allocation2 + $0xf4] ss:$8 sps:$4 sm:$0xff]   ;;  %v2423_v27 = vld [vmem:[#allocation2 + $0xf0] ss:$8 sps:$4 sm:$0xff]   ;;  %v648_v3 = vunpack.c.0.s8 %v647_v62  ;;  %s3070_s16 = scalar_lea.hbm %s3126_s9, %s2165_s27 }
  0x3e   : > { %v2424_v28 = vld [vmem:[#allocation2 + $0xe4] ss:$8 sps:$4 sm:$0xff]   ;;  %v2426_v29 = vld [vmem:[#allocation2 + $0xe0] ss:$8 sps:$4 sm:$0xff]   ;;  %v2427_v30 = vld [vmem:[#allocation2 + $0xd4] ss:$8 sps:$4 sm:$0xff]  }
  0x3f   : > { %912 = vmatpush1.bf16.msra.mxu1 %v2405_v12  ;;  %v2393_v31 = vld [vmem:[%s2787_s29 + $0x30] sm:$0xff]   ;;  %v2430_v33 = vld [vmem:[#allocation2 + $0xc4] ss:$8 sps:$4 sm:$0xff]   ;;  %v2432_v34 = vld [vmem:[#allocation2 + $0xc0] ss:$8 sps:$4 sm:$0xff]   ;;  %v2824_v8 = vsub.s32 %v648_v3, %v650_v4  ;;  %s3077_s13 = scalar_lea.sflag [#allocation4], %s354_s25 }
  0x40   : > { %913 = vmatprep.subr.bf16.mxu1 %v2406_v13  ;;  %v2429_v32 = vld [vmem:[#allocation2 + $0xd0] ss:$8 sps:$4 sm:$0xff]   ;;  %v2433_v35 = vld [vmem:[#allocation2 + $0xb4] ss:$8 sps:$4 sm:$0xff]   ;;  %v2395_v38 = vld [vmem:[%s2787_s29 + $0x40] sm:$0xff]   ;;  %s2561_s17 = scalar_lea.vmem %s3072_s28, 1280 }
  0x41   : > { %v2394_v36 = vld [vmem:[%s2787_s29 + $0x38] sm:$0xff]   ;;  %v2436_v39 = vld [vmem:[#allocation2 + $0xa4] ss:$8 sps:$4 sm:$0xff]   ;;  %v2438_v40 = vld [vmem:[#allocation2 + $0xa0] ss:$8 sps:$4 sm:$0xff]   ;;  %p2562_p10 = scmp.ne.s32.totalorder %s3072_s28, %s2561_s17  ;;  %s2637_s22 = smov [#allocation7]  }
  0x42   : > { %v2435_v37 = vld [vmem:[#allocation2 + $0xb0] ss:$8 sps:$4 sm:$0xff]   ;;  %v2396_v41 = vld [vmem:[%s2787_s29 + $0x48] sm:$0xff]   ;;  %v2439_v42 = vld [vmem:[#allocation2 + $0x94] ss:$8 sps:$4 sm:$0xff]   ;;  %s2565_s23 = sshll.u32 %s2637_s22, 4  ;;  %s2566_s23 = int_to_ptr.vmem [resolvable:$false] %s2565_s23 }
  0x43   : > { %2029 = vmatmul.mubr.msk.bf16.gmra.mxu0 %vm446_vm1, %v2388_v5  ;;  %914 = vmatpush1.bf16.msra.mxu1 %v2408_v14  ;;  %v2441_v43 = vld [vmem:[#allocation2 + $0x90] ss:$8 sps:$4 sm:$0xff]   ;;  %v2442_v44 = vld [vmem:[#allocation2 + $0x84] ss:$8 sps:$4 sm:$0xff]   ;;  %v2444_v45 = vld [vmem:[#allocation2 + $0x80] ss:$8 sps:$4 sm:$0xff]   ;;  %p2563_p12 = pnand %p2562_p10, %p2728_p5  ;;  %p2568_p11 = scmp.lt.s32.totalorder %s3072_s28, %s2566_s23 }
  0x44   : > { %536 = vmatprep.mubr.bf16.mxu0 %v2635_v0  ;;  %915 = vmatprep.subr.bf16.mxu1 %v2409_v15  ;;  %v2445_v46 = vld [vmem:[#allocation5 + $0x70] ss:$8 sps:$4 sm:$0xff]   ;;  %v2447_v47 = vld [vmem:[#allocation5 + $0x74] ss:$8 sps:$4 sm:$0xff]   ;;  %v2450_v48 = vld [vmem:[#allocation5 + $0x64] ss:$8 sps:$4 sm:$0xff]  }
  0x45   : > { %1330 = vmatprep.subr.bf16.mxu0 %v2447_v47  ;;  %v2448_v49 = vld [vmem:[#allocation5 + $0x60] ss:$8 sps:$4 sm:$0xff]   ;;  %v2453_v50 = vld [vmem:[#allocation5 + $0x54] ss:$8 sps:$4 sm:$0xff]   ;;  %v2451_v51 = vld [vmem:[#allocation5 + $0x50] ss:$8 sps:$4 sm:$0xff]   ;;  %p2564_p8 = pneg %p2563_p12 }
  0x46   : > { %1331 = vmatpush1.bf16.msra.mxu0 %v2445_v46  ;;  %v2456_v52 = vld [vmem:[#allocation5 + $0x44] ss:$8 sps:$4 sm:$0xff]   ;;  %v2454_v53 = vld [vmem:[#allocation5 + $0x40] ss:$8 sps:$4 sm:$0xff]   ;;  %v2459_v54 = vld [vmem:[#allocation5 + $0x34] ss:$8 sps:$4 sm:$0xff]  }
  0x47   : > { %916 = vmatpush1.bf16.msra.mxu1 %v2411_v17  ;;  %1332 = vmatprep.subr.bf16.mxu0 %v2450_v48  ;;  %v2457_v55 = vld [vmem:[#allocation5 + $0x30] ss:$8 sps:$4 sm:$0xff]   ;;  %v2462_v56 = vld [vmem:[#allocation5 + $0x24] ss:$8 sps:$4 sm:$0xff]   ;;  %v2460_v57 = vld [vmem:[#allocation5 + $0x20] ss:$8 sps:$4 sm:$0xff]  }
  0x48   : > { %917 = vmatprep.subr.bf16.mxu1 %v2412_v18  ;;  %v2465_v58 = vld [vmem:[#allocation5 + $0x14] ss:$8 sps:$4 sm:$0xff]   ;;  %v2463_v59 = vld [vmem:[#allocation5 + $0x10] ss:$8 sps:$4 sm:$0xff]   ;;  %v2468_v60 = vld [vmem:[#allocation5 + $0x4] ss:$8 sps:$4 sm:$0xff]  }
  0x49   : > { %v2466_v1 = vld [vmem:[#allocation5] ss:$8 sps:$4 sm:$0xff]   ;;  %v2471_v2 = vld [vmem:[#allocation5 + $0xf4] ss:$8 sps:$4 sm:$0xff]   ;;  %v2469_v5 = vld [vmem:[#allocation5 + $0xf0] ss:$8 sps:$4 sm:$0xff]  }
  0x4a   : > { %1333 = vmatpush1.bf16.msra.mxu0 %v2448_v49  ;;  %v2038_v6 = vld.sshfl [vmem:[%s3119_s2] sm:$0x11 pattern:$0x75316420]  ;;  %v2474_v7 = vld [vmem:[#allocation5 + $0xe4] ss:$8 sps:$4 sm:$0xff]  }
  0x4b   : > { %2030 = vmatmul.mubr.msk.bf16.gmra.mxu0 %vm446_vm1, %v2389_v11  ;;  %918 = vmatpush1.bf16.msra.mxu1 %v2414_v19  ;;  %v645_v9 = vcombine.high %v2038_v6, %v2038_v6  ;;  %v2472_v10 = vld [vmem:[#allocation5 + $0xe0] ss:$8 sps:$4 sm:$0xff]   ;;  %v2477_v11 = vld [vmem:[#allocation5 + $0xd4] ss:$8 sps:$4 sm:$0xff]   ;;  %v652_v12 = vrot.slane %v2038_v6, %v2824_v8  ;;  %v2475_v14 = vld [vmem:[#allocation5 + $0xd0] ss:$8 sps:$4 sm:$0xff]  }
  0x4c   : > { %546 = vmatprep.mubr.bf16.mxu0 %v2635_v0  ;;  %919 = vmatprep.subr.bf16.mxu1 %v2415_v20  ;;  %v2480_v15 = vld [vmem:[#allocation5 + $0xc4] ss:$8 sps:$4 sm:$0xff]   ;;  %v2828_v18 = vsub.s32 0, %v650_v4  ;;  %v2478_v20 = vld [vmem:[#allocation5 + $0xc0] ss:$8 sps:$4 sm:$0xff]   ;;  %s2567_s21 = scalar_lea.vmem %s2566_s23, 2560 }
  0x4d   : > { %1334 = vmatprep.subr.bf16.mxu0 %v2453_v50  ;;  %v659_v13 = vrot.slane %v645_v9, %v2824_v8  ;;  %v661_v17 = vpack.i.b16 %v652_v12, %v652_v12  ;;  %p2569_p0 = scmp.lt.s32.totalorder %s2567_s21, %s2561_s17 }
  0x4e   : > { %1335 = vmatpush1.bf16.msra.mxu0 %v2451_v51 }
  0x4f   : > { %920 = vmatpush1.bf16.msra.mxu1 %v2417_v22  ;;  %1336 = vmatprep.subr.bf16.mxu0 %v2456_v52  ;;  %v668_v19 = vpack.i.b16 %v659_v13, %v659_v13  ;;  %v2483_v22 = vld [vmem:[#allocation5 + $0xb4] ss:$8 sps:$4 sm:$0xff]   ;;  %p2570_p1 = por %p2569_p0, %p2568_p11 }
  0x50   : > { %921 = vmatprep.subr.bf16.mxu1 %v2418_v23 }
  0x51   : > { %p2571_p3 = pnand %p2570_p1, %p2564_p8 }
  0x52   : > { %1337 = vmatpush1.bf16.msra.mxu0 %v2454_v53 }
  0x53   : > { %2031 = vmatmul.mubr.msk.bf16.gmra.mxu0 %vm446_vm1, %v2390_v16  ;;  %922 = vmatpush1.bf16.msra.mxu1 %v2420_v24  ;;  %v2831_v24 = vrot.slane %v661_v17, %v2828_v18 }
  0x54   : > { %556 = vmatprep.mubr.bf16.mxu0 %v2635_v0  ;;  %923 = vmatprep.subr.bf16.mxu1 %v2421_v25 }
  0x55   : > { %1338 = vmatprep.subr.bf16.mxu0 %v2459_v54 }
  0x56   : > { %1339 = vmatpush1.bf16.msra.mxu0 %v2457_v55 }
  0x57   : > { %924 = vmatpush2.bf16.msra.mxu1 %v2423_v27  ;;  %1340 = vmatprep.subr.bf16.mxu0 %v2462_v56  ;;  %v2481_v27 = vld [vmem:[#allocation5 + $0xb0] ss:$8 sps:$4 sm:$0xff]  }
  0x58   : > { %925 = vmatprep.subr.bf16.mxu1 %v2424_v28 }
  0x5a   : > { %1341 = vmatpush1.bf16.msra.mxu0 %v2460_v57 }
  0x5b   : > { %2032 = vmatmul.mubr.msk.bf16.gmra.mxu0 %vm446_vm1, %v2391_v21  ;;  %926 = vmatpush2.bf16.msra.mxu1 %v2426_v29  ;;  %v2486_v29 = vld [vmem:[#allocation5 + $0xa4] ss:$8 sps:$4 sm:$0xff]  }
  0x5c   : > { %566 = vmatprep.mubr.bf16.mxu0 %v2635_v0  ;;  %927 = vmatprep.subr.bf16.mxu1 %v2427_v30 }
  0x5d   : > { %1342 = vmatprep.subr.bf16.mxu0 %v2465_v58 }
  0x5e   : > { %1343 = vmatpush1.bf16.msra.mxu0 %v2463_v59 }
  0x5f   : > { %928 = vmatpush2.bf16.msra.mxu1 %v2429_v32  ;;  %1344 = vmatprep.subr.bf16.mxu0 %v2468_v60 }
  0x60   : > { %929 = vmatprep.subr.bf16.mxu1 %v2430_v33 }
  0x62   : > { %1345 = vmatpush1.bf16.msra.mxu0 %v2466_v1 }
  0x63   : > { %2033 = vmatmul.mubr.msk.bf16.gmra.mxu0 %vm446_vm1, %v2392_v26  ;;  %930 = vmatpush2.bf16.msra.mxu1 %v2432_v34  ;;  %v2834_v26 = vrot.slane %v668_v19, %v2828_v18  ;;  %v2484_v34 = vld [vmem:[#allocation5 + $0xa0] ss:$8 sps:$4 sm:$0xff]  }
  0x64   : > { %576 = vmatprep.mubr.bf16.mxu0 %v2635_v0  ;;  %931 = vmatprep.subr.bf16.mxu1 %v2433_v35 }
  0x65   : > { %1346 = vmatprep.subr.bf16.mxu0 %v2471_v2 }
  0x66   : > { %1347 = vmatpush2.bf16.msra.mxu0 %v2469_v5 }
  0x67   : > { %932 = vmatpush2.bf16.msra.mxu1 %v2435_v37  ;;  %1348 = vmatprep.subr.bf16.mxu0 %v2474_v7 }
  0x68   : > { %933 = vmatprep.subr.bf16.mxu1 %v2436_v39 }
  0x6a   : > { %1349 = vmatpush2.bf16.msra.mxu0 %v2472_v10 }
  0x6b   : > { %2034 = vmatmul.mubr.msk.bf16.gmra.mxu0 %vm446_vm1, %v2393_v31  ;;  %934 = vmatpush2.bf16.msra.mxu1 %v2438_v40 }
  0x6c   : > { %586 = vmatprep.mubr.bf16.mxu0 %v2635_v0  ;;  %935 = vmatprep.subr.bf16.mxu1 %v2439_v42 }
  0x6d   : > { %1350 = vmatprep.subr.bf16.mxu0 %v2477_v11 }
  0x6e   : > { %1351 = vmatpush2.bf16.msra.mxu0 %v2475_v14 }
  0x6f   : > { %936 = vmatpush2.bf16.msra.mxu1 %v2441_v43  ;;  %1352 = vmatprep.subr.bf16.mxu0 %v2480_v15 }
  0x70   : > { %937 = vmatprep.subr.bf16.mxu1 %v2442_v44 }
  0x72   : > { %1353 = vmatpush2.bf16.msra.mxu0 %v2478_v20 }
  0x73   : > { %2035 = vmatmul.mubr.msk.bf16.gmra.mxu0 %vm446_vm1, %v2394_v36  ;;  %938 = vmatpush2.bf16.msra.mxu1 %v2444_v45 }
  0x74   : > { %596 = vmatprep.mubr.bf16.mxu0 %v2635_v0  ;;  %1354 = vmatprep.subr.bf16.mxu0 %v2483_v22 }
  0x76   : > { %1355 = vmatpush2.bf16.msra.mxu0 %v2481_v27 }
  0x77   : > { %1356 = vmatprep.subr.bf16.mxu0 %v2486_v29 }
  0x7a   : > { %1357 = vmatpush2.bf16.msra.mxu0 %v2484_v34 }
  0x7b   : > { %2036 = vmatmul.mubr.msk.bf16.gmra.mxu0 %vm446_vm1, %v2395_v38 }
  0x7c   : > { %606 = vmatprep.mubr.bf16.mxu0 %v2635_v0 }
  0x83   : > { %2037 = vmatmul.mubr.msk.bf16.gmra.mxu0 %vm446_vm1, %v2396_v41 }
  0xfb   : > { %v518_v16 = vpop.f32.mrf.mxu0 }
  0xfd   : > { %v520_v21 = vpop.f32.mrf.mxu0 }
  0xff   : > { %v522_v23 = vpop.f32.mrf.mxu0 }
 0x100   : > { %v617_v25 = vpack.c.bf16 %v522_v23, %v518_v16 }
 0x101   : > { %v524_v28 = vpop.f32.mrf.mxu0 }
 0x102   : > { %v618_v30 = vpack.c.bf16 %v524_v28, %v520_v21  ;;  %v674_v31 = vadd.bf16 %v2831_v24, %v617_v25 }
 0x103   : > { %v528_v32 = vpop.f32.mrf.mxu0 }
 0x104   : > { %v675_v33 = vadd.bf16 %v2834_v26, %v618_v30  ;;  %v694_v38 = vmax.bf16 %v2635_v0, %v674_v31 }
 0x105   : > { %v530_v35 = vpop.f32.mrf.mxu0 }
 0x106   : > { %v695_v36 = vmax.bf16 %v2635_v0, %v675_v33 }
 0x107   : > { %v532_v37 = vpop.f32.mrf.mxu0 }
 0x108   : > { %v619_v39 = vpack.c.bf16 %v532_v37, %v528_v32  ;;  %939 = vmatprep.mubr.bf16.mxu1 %v695_v36 }
 0x109   : > { %v534_v40 = vpop.f32.mrf.mxu0  ;;  %940 = vmatmul.mubr.bf16.vlgmr.msra.gmra.mxu1 %v694_v38 }
 0x10a   : > { %v620_v41 = vpack.c.bf16 %v534_v40, %v530_v35  ;;  %v676_v42 = vadd.bf16 %v2831_v24, %v619_v39 }
 0x10b   : > { %v538_v43 = vpop.f32.mrf.mxu0 }
 0x10c   : > { %v677_v44 = vadd.bf16 %v2834_v26, %v620_v41  ;;  %v696_v48 = vmax.bf16 %v2635_v0, %v676_v42 }
 0x10d   : > { %v540_v45 = vpop.f32.mrf.mxu0 }
 0x10e   : > { %v697_v46 = vmax.bf16 %v2635_v0, %v677_v44 }
 0x10f   : > { %v542_v47 = vpop.f32.mrf.mxu0 }
 0x110   : > { %v621_v49 = vpack.c.bf16 %v542_v47, %v538_v43  ;;  %949 = vmatprep.mubr.bf16.mxu1 %v697_v46 }
 0x111   : > { %v544_v50 = vpop.f32.mrf.mxu0  ;;  %950 = vmatmul.mubr.bf16.gmra.mxu1 %v696_v48 }
 0x112   : > { %v622_v51 = vpack.c.bf16 %v544_v50, %v540_v45  ;;  %v678_v52 = vadd.bf16 %v2831_v24, %v621_v49 }
 0x113   : > { %v548_v53 = vpop.f32.mrf.mxu0 }
 0x114   : > { %v679_v54 = vadd.bf16 %v2834_v26, %v622_v51  ;;  %v698_v58 = vmax.bf16 %v2635_v0, %v678_v52 }
 0x115   : > { %v550_v55 = vpop.f32.mrf.mxu0 }
 0x116   : > { %v699_v56 = vmax.bf16 %v2635_v0, %v679_v54 }
 0x117   : > { %v552_v57 = vpop.f32.mrf.mxu0 }
 0x118   : > { %v623_v59 = vpack.c.bf16 %v552_v57, %v548_v53  ;;  %959 = vmatprep.mubr.bf16.mxu1 %v699_v56 }
 0x119   : > { %v554_v60 = vpop.f32.mrf.mxu0  ;;  %960 = vmatmul.mubr.bf16.gmra.mxu1 %v698_v58 }
 0x11a   : > { %v624_v61 = vpack.c.bf16 %v554_v60, %v550_v55  ;;  %v680_v62 = vadd.bf16 %v2831_v24, %v623_v59 }
 0x11b   : > { %v558_v63 = vpop.f32.mrf.mxu0 }
 0x11c   : > { %v681_v1 = vadd.bf16 %v2834_v26, %v624_v61  ;;  %v700_v5 = vmax.bf16 %v2635_v0, %v680_v62 }
 0x11d   : > { %v560_v2 = vpop.f32.mrf.mxu0 }
 0x11e   : > { %v701_v3 = vmax.bf16 %v2635_v0, %v681_v1  ;;  %v2487_v1 = vld [vmem:[#allocation5 + $0x90] ss:$8 sps:$4 sm:$0xff]  }
 0x11f   : > { %v562_v4 = vpop.f32.mrf.mxu0 }
 0x120   : > { %v625_v6 = vpack.c.bf16 %v562_v4, %v558_v63  ;;  %969 = vmatprep.mubr.bf16.mxu1 %v701_v3 }
 0x121   : > { %v564_v7 = vpop.f32.mrf.mxu0  ;;  %970 = vmatmul.mubr.bf16.gmra.mxu1 %v700_v5 }
 0x122   : > { %v626_v9 = vpack.c.bf16 %v564_v7, %v560_v2  ;;  %v682_v10 = vadd.bf16 %v2831_v24, %v625_v6  ;;  %v2489_v2 = vld [vmem:[#allocation5 + $0x94] ss:$8 sps:$4 sm:$0xff]   ;;  %v2492_v6 = vld [vmem:[#allocation5 + $0x84] ss:$8 sps:$4 sm:$0xff]   ;;  %v2490_v7 = vld [vmem:[#allocation5 + $0x80] ss:$8 sps:$4 sm:$0xff]  }
 0x123   : > { %v568_v11 = vpop.f32.mrf.mxu0  ;;  %1358 = vmatprep.subr.bf16.mxu0 %v2489_v2 }
 0x124   : > { %v683_v12 = vadd.bf16 %v2834_v26, %v626_v9  ;;  %v702_v16 = vmax.bf16 %v2635_v0, %v682_v10  ;;  %1359 = vmatpush2.bf16.msra.mxu0 %v2487_v1  ;;  %v2495_v9 = vld [vmem:[%s3124_s7 + $0x70] sm:$0xff]  }
 0x125   : > { %v570_v13 = vpop.f32.mrf.mxu0  ;;  %1360 = vmatprep.subr.bf16.mxu0 %v2492_v6  ;;  %v2496_v10 = vld [vmem:[%s3124_s7 + $0x30] sm:$0xff]  }
 0x126   : > { %v703_v14 = vmax.bf16 %v2635_v0, %v683_v12  ;;  %v2498_v12 = vld [vmem:[%s3124_s7 + $0x28] sm:$0xff]  }
 0x127   : > { %v572_v15 = vpop.f32.mrf.mxu0 }
 0x128   : > { %v627_v17 = vpack.c.bf16 %v572_v15, %v568_v11  ;;  %979 = vmatprep.mubr.bf16.mxu1 %v703_v14  ;;  %1361 = vmatpush2.bf16.msra.mxu0 %v2490_v7  ;;  %v2497_v11 = vld [vmem:[%s3124_s7 + $0x68] sm:$0xff]   ;;  %v2500_v14 = vld [vmem:[%s3124_s7 + $0x20] sm:$0xff]   ;;  %v2501_v15 = vld [vmem:[%s3124_s7 + $0x58] sm:$0xff]  }
 0x129   : > { %v574_v19 = vpop.f32.mrf.mxu0  ;;  %980 = vmatmul.mubr.bf16.gmra.mxu1 %v702_v16  ;;  %v2502_v16 = vld [vmem:[%s3124_s7 + $0x18] sm:$0xff]  }
 0x12a   : > { %v628_v20 = vpack.c.bf16 %v574_v19, %v570_v13  ;;  %v684_v21 = vadd.bf16 %v2831_v24, %v627_v17  ;;  %v2499_v13 = vld [vmem:[%s3124_s7 + $0x60] sm:$0xff]  }
 0x12b   : > { %v578_v22 = vpop.f32.mrf.mxu0  ;;  %v2071_v17 = vld.sshfl [vmem:[%s3121_s4] sm:$0x11 pattern:$0x75316420] }
 0x12c   : > { %v685_v23 = vadd.bf16 %v2834_v26, %v628_v20  ;;  %v704_v29 = vmax.bf16 %v2635_v0, %v684_v21  ;;  %v1068_v19 = vcombine.high %v2071_v17, %v2071_v17  ;;  %v1075_v20 = vrot.slane %v2071_v17, %v2824_v8 }
 0x12d   : > { %v580_v25 = vpop.f32.mrf.mxu0 }
 0x12e   : > { %v705_v27 = vmax.bf16 %v2635_v0, %v685_v23  ;;  %v1082_v21 = vrot.slane %v1068_v19, %v2824_v8  ;;  %v1084_v23 = vpack.i.b16 %v1075_v20, %v1075_v20 }
 0x12f   : > { %v582_v28 = vpop.f32.mrf.mxu0 }
 0x130   : > { %v629_v30 = vpack.c.bf16 %v582_v28, %v578_v22  ;;  %989 = vmatprep.mubr.bf16.mxu1 %v705_v27 }
 0x131   : > { %v584_v31 = vpop.f32.mrf.mxu0  ;;  %990 = vmatmul.mubr.bf16.gmra.mxu1 %v704_v29  ;;  %v2912_v29 = vrot.slane %v1084_v23, %v2828_v18 }
 0x132   : > { %v630_v32 = vpack.c.bf16 %v584_v31, %v580_v25  ;;  %v686_v33 = vadd.bf16 %v2831_v24, %v629_v30  ;;  %v1091_v25 = vpack.i.b16 %v1082_v21, %v1082_v21 }
 0x133   : > { %v588_v34 = vpop.f32.mrf.mxu0 }
 0x134   : > { %v687_v35 = vadd.bf16 %v2834_v26, %v630_v32  ;;  %v706_v39 = vmax.bf16 %v2635_v0, %v686_v33  ;;  %v2915_v31 = vrot.slane %v1091_v25, %v2828_v18 }
 0x135   : > { %v590_v36 = vpop.f32.mrf.mxu0 }
 0x136   : > { %v707_v37 = vmax.bf16 %v2635_v0, %v687_v35 }
 0x137   : > { %v592_v38 = vpop.f32.mrf.mxu0 }
 0x138   : > { %v631_v40 = vpack.c.bf16 %v592_v38, %v588_v34  ;;  %999 = vmatprep.mubr.bf16.mxu1 %v707_v37 }
 0x139   : > { %v594_v41 = vpop.f32.mrf.mxu0  ;;  %1000 = vmatmul.mubr.bf16.gmra.mxu1 %v706_v39 }
 0x13a   : > { %v632_v42 = vpack.c.bf16 %v594_v41, %v590_v36  ;;  %v688_v43 = vadd.bf16 %v2831_v24, %v631_v40 }
 0x13b   : > { %v598_v44 = vpop.f32.mrf.mxu0 }
 0x13c   : > { %v689_v45 = vadd.bf16 %v2834_v26, %v632_v42  ;;  %v708_v49 = vmax.bf16 %v2635_v0, %v688_v43 }
 0x13d   : > { %v600_v46 = vpop.f32.mrf.mxu0 }
 0x13e   : > { %v709_v47 = vmax.bf16 %v2635_v0, %v689_v45 }
 0x13f   : > { %v602_v48 = vpop.f32.mrf.mxu0 }
 0x140   : > { %v633_v50 = vpack.c.bf16 %v602_v48, %v598_v44  ;;  %1009 = vmatprep.mubr.bf16.mxu1 %v709_v47 }
 0x141   : > { %v604_v51 = vpop.f32.mrf.mxu0  ;;  %1010 = vmatmul.mubr.bf16.gmra.mxu1 %v708_v49 }
 0x142   : > { %v634_v52 = vpack.c.bf16 %v604_v51, %v600_v46  ;;  %v690_v53 = vadd.bf16 %v2831_v24, %v633_v50 }
 0x143   : > { %v608_v54 = vpop.f32.mrf.mxu0 }
 0x144   : > { %v691_v55 = vadd.bf16 %v2834_v26, %v634_v52  ;;  %v710_v59 = vmax.bf16 %v2635_v0, %v690_v53 }
 0x145   : > { %v610_v56 = vpop.f32.mrf.mxu0 }
 0x146   : > { %v711_v57 = vmax.bf16 %v2635_v0, %v691_v55 }
 0x147   : > { %v612_v58 = vpop.f32.mrf.mxu0 }
 0x148   : > { %v635_v60 = vpack.c.bf16 %v612_v58, %v608_v54  ;;  %1019 = vmatprep.mubr.bf16.mxu1 %v711_v57 }
 0x149   : > { %v614_v61 = vpop.f32.mrf.mxu0  ;;  %1020 = vmatmul.mubr.bf16.gmra.mxu1 %v710_v59 }
 0x14a   : > { %v636_v62 = vpack.c.bf16 %v614_v61, %v610_v56  ;;  %v692_v63 = vadd.bf16 %v2831_v24, %v635_v60  ;;  %v2493_v24 = vld [vmem:[%s3124_s7 + $0x78] sm:$0xff]  }
 0x14b   : > { %2301 = vmatprep.subr.bf16.mxu1 %v2493_v24  ;;  %2225 = vmatprep.subr.bf16.mxu0 %v2493_v24 }
 0x14c   : > { %v693_v3 = vadd.bf16 %v2834_v26, %v636_v62  ;;  %v712_v5 = vmax.bf16 %v2635_v0, %v692_v63  ;;  %v2494_v26 = vld [vmem:[%s3124_s7 + $0x38] sm:$0xff]  }
 0x14d   : > { %2309 = vmatpush3.bf16.msra.mxu1 %v2494_v26 }
 0x14e   : > { %v713_v4 = vmax.bf16 %v2635_v0, %v693_v3  ;;  %2302 = vmatprep.subr.bf16.mxu1 %v2495_v9 }
 0x150   : > { %1029 = vmatprep.mubr.bf16.mxu1 %v713_v4 }
 0x151   : > { %1030 = vmatmul.mubr.bf16.gmra.mxu1 %v712_v5 }
 0x152   : > { %2310 = vmatpush3.bf16.msra.mxu1 %v2496_v10 }
 0x153   : > { %2303 = vmatprep.subr.bf16.mxu1 %v2497_v11 }
 0x156   : > { %2311 = vmatpush3.bf16.msra.mxu1 %v2498_v12 }
 0x157   : > { %2304 = vmatprep.subr.bf16.mxu1 %v2499_v13 }
 0x15a   : > { %2312 = vmatpush3.bf16.msra.mxu1 %v2500_v14 }
 0x15b   : > { %2305 = vmatprep.subr.bf16.mxu1 %v2501_v15 }
 0x15e   : > { %2313 = vmatpush3.bf16.msra.mxu1 %v2502_v16 }
 0x1c9   : > { %v941_v22 = vpop.f32.mrf.mxu1 }
 0x1cb   : > { %v943_v27 = vpop.f32.mrf.mxu1 }
 0x1cd   : > { %v945_v28 = vpop.f32.mrf.mxu1 }
 0x1ce   : > { %v1040_v30 = vpack.c.bf16 %v945_v28, %v941_v22 }
 0x1cf   : > { %v947_v32 = vpop.f32.mrf.mxu1 }
 0x1d0   : > { %v1041_v33 = vpack.c.bf16 %v947_v32, %v943_v27  ;;  %v1097_v34 = vadd.bf16 %v2912_v29, %v1040_v30 }
 0x1d1   : > { %v951_v35 = vpop.f32.mrf.mxu1 }
 0x1d2   : > { %v1098_v36 = vadd.bf16 %v2915_v31, %v1041_v33  ;;  %v1117_v39 = vmax.bf16 %v2635_v0, %v1097_v34 }
 0x1d3   : > { %v953_v37 = vpop.f32.mrf.mxu1 }
 0x1d4   : > { %v1118_v38 = vmax.bf16 %v2635_v0, %v1098_v36 }
 0x1d5   : > { %v955_v40 = vpop.f32.mrf.mxu1 }
 0x1d6   : > { %v1042_v41 = vpack.c.bf16 %v955_v40, %v951_v35  ;;  %1362 = vmatprep.mubr.bf16.mxu0 %v1118_v38 }
 0x1d7   : > { %v957_v42 = vpop.f32.mrf.mxu1  ;;  %1363 = vmatmul.mubr.bf16.vlgmr.msra.gmra.mxu0 %v1117_v39 }
 0x1d8   : > { %v1043_v43 = vpack.c.bf16 %v957_v42, %v953_v37  ;;  %2226 = vmatpush3.bf16.msra.mxu0 %v2494_v26  ;;  %v1099_v44 = vadd.bf16 %v2912_v29, %v1042_v41 }
 0x1d9   : > { %v961_v45 = vpop.f32.mrf.mxu1  ;;  %2227 = vmatprep.subr.bf16.mxu0 %v2495_v9 }
 0x1da   : > { %v1100_v46 = vadd.bf16 %v2915_v31, %v1043_v43  ;;  %v1119_v50 = vmax.bf16 %v2635_v0, %v1099_v44 }
 0x1db   : > { %v963_v47 = vpop.f32.mrf.mxu1 }
 0x1dc   : > { %v1120_v48 = vmax.bf16 %v2635_v0, %v1100_v46  ;;  %2228 = vmatpush3.bf16.msra.mxu0 %v2496_v10 }
 0x1dd   : > { %v965_v49 = vpop.f32.mrf.mxu1  ;;  %2229 = vmatprep.subr.bf16.mxu0 %v2497_v11 }
 0x1de   : > { %v1044_v51 = vpack.c.bf16 %v965_v49, %v961_v45  ;;  %1372 = vmatprep.mubr.bf16.mxu0 %v1120_v48 }
 0x1df   : > { %v967_v52 = vpop.f32.mrf.mxu1  ;;  %1373 = vmatmul.mubr.bf16.gmra.mxu0 %v1119_v50 }
 0x1e0   : > { %v1045_v53 = vpack.c.bf16 %v967_v52, %v963_v47  ;;  %2230 = vmatpush3.bf16.msra.mxu0 %v2498_v12  ;;  %v1101_v54 = vadd.bf16 %v2912_v29, %v1044_v51 }
 0x1e1   : > { %v971_v55 = vpop.f32.mrf.mxu1  ;;  %2231 = vmatprep.subr.bf16.mxu0 %v2499_v13 }
 0x1e2   : > { %v1102_v56 = vadd.bf16 %v2915_v31, %v1045_v53  ;;  %v1121_v60 = vmax.bf16 %v2635_v0, %v1101_v54 }
 0x1e3   : > { %v973_v57 = vpop.f32.mrf.mxu1 }
 0x1e4   : > { %v1122_v58 = vmax.bf16 %v2635_v0, %v1102_v56  ;;  %2232 = vmatpush3.bf16.msra.mxu0 %v2500_v14 }
 0x1e5   : > { %v975_v59 = vpop.f32.mrf.mxu1  ;;  %2233 = vmatprep.subr.bf16.mxu0 %v2501_v15 }
 0x1e6   : > { %v1046_v61 = vpack.c.bf16 %v975_v59, %v971_v55  ;;  %1382 = vmatprep.mubr.bf16.mxu0 %v1122_v58 }
 0x1e7   : > { %v977_v62 = vpop.f32.mrf.mxu1  ;;  %1383 = vmatmul.mubr.bf16.gmra.mxu0 %v1121_v60 }
 0x1e8   : > { %v1047_v63 = vpack.c.bf16 %v977_v62, %v973_v57  ;;  %2234 = vmatpush3.bf16.msra.mxu0 %v2502_v16  ;;  %v1103_v1 = vadd.bf16 %v2912_v29, %v1046_v61 }
 0x1e9   : > { %v981_v2 = vpop.f32.mrf.mxu1 }
 0x1ea   : > { %v1104_v3 = vadd.bf16 %v2915_v31, %v1047_v63  ;;  %v1123_v7 = vmax.bf16 %v2635_v0, %v1103_v1  ;;  %v2503_v1 = vld [vmem:[%s3124_s7 + $0x50] sm:$0xff]  }
 0x1eb   : > { %v983_v4 = vpop.f32.mrf.mxu1  ;;  %2235 = vmatprep.subr.bf16.mxu0 %v2503_v1  ;;  %2306 = vmatprep.subr.bf16.mxu1 %v2503_v1 }
 0x1ec   : > { %v1124_v5 = vmax.bf16 %v2635_v0, %v1104_v3  ;;  %v2504_v3 = vld [vmem:[%s3124_s7 + $0x10] sm:$0xff]  }
 0x1ed   : > { %v985_v6 = vpop.f32.mrf.mxu1  ;;  %2236 = vmatpush3.bf16.msra.mxu0 %v2504_v3  ;;  %2314 = vmatpush3.bf16.msra.mxu1 %v2504_v3 }
 0x1ee   : > { %v1048_v24 = vpack.c.bf16 %v985_v6, %v981_v2  ;;  %1392 = vmatprep.mubr.bf16.mxu0 %v1124_v5  ;;  %v2505_v6 = vld [vmem:[%s3124_s7 + $0x48] sm:$0xff]  }
 0x1ef   : > { %v987_v26 = vpop.f32.mrf.mxu1  ;;  %1393 = vmatmul.mubr.bf16.gmra.mxu0 %v1123_v7  ;;  %2237 = vmatprep.subr.bf16.mxu0 %v2505_v6 }
 0x1f0   : > { %v1049_v9 = vpack.c.bf16 %v987_v26, %v983_v4  ;;  %v1105_v10 = vadd.bf16 %v2912_v29, %v1048_v24  ;;  %v2506_v24 = vld [vmem:[%s3124_s7 + $0x8] sm:$0xff]   ;;  %2307 = vmatprep.subr.bf16.mxu1 %v2505_v6 }
 0x1f1   : > { %v991_v11 = vpop.f32.mrf.mxu1  ;;  %2238 = vmatpush3.bf16.msra.mxu0 %v2506_v24  ;;  %2315 = vmatpush3.bf16.msra.mxu1 %v2506_v24 }
 0x1f2   : > { %v1106_v12 = vadd.bf16 %v2915_v31, %v1049_v9  ;;  %v1125_v16 = vmax.bf16 %v2635_v0, %v1105_v10  ;;  %v2104_v9 = vld.sshfl [vmem:[%s3123_s6] sm:$0x11 pattern:$0x75316420] }
 0x1f3   : > { %v993_v13 = vpop.f32.mrf.mxu1  ;;  %v1491_v10 = vcombine.high %v2104_v9, %v2104_v9 }
 0x1f4   : > { %v1126_v14 = vmax.bf16 %v2635_v0, %v1106_v12 }
 0x1f5   : > { %v995_v15 = vpop.f32.mrf.mxu1  ;;  %v1505_v12 = vrot.slane %v1491_v10, %v2824_v8 }
 0x1f6   : > { %v1050_v17 = vpack.c.bf16 %v995_v15, %v991_v11  ;;  %1402 = vmatprep.mubr.bf16.mxu0 %v1126_v14  ;;  %v1498_v11 = vrot.slane %v2104_v9, %v2824_v8 }
 0x1f7   : > { %v997_v19 = vpop.f32.mrf.mxu1  ;;  %1403 = vmatmul.mubr.bf16.gmra.mxu0 %v1125_v16  ;;  %v1514_v15 = vpack.i.b16 %v1505_v12, %v1505_v12 }
 0x1f8   : > { %v1051_v20 = vpack.c.bf16 %v997_v19, %v993_v13  ;;  %v1107_v21 = vadd.bf16 %v2912_v29, %v1050_v17  ;;  %v1507_v14 = vpack.i.b16 %v1498_v11, %v1498_v11 }
 0x1f9   : > { %v1001_v22 = vpop.f32.mrf.mxu1 }
 0x1fa   : > { %v1108_v23 = vadd.bf16 %v2915_v31, %v1051_v20  ;;  %v1127_v30 = vmax.bf16 %v2635_v0, %v1107_v21  ;;  %v2981_v19 = vrot.slane %v1507_v14, %v2828_v18  ;;  %v2984_v21 = vrot.slane %v1514_v15, %v2828_v18 }
 0x1fb   : > { %v1003_v25 = vpop.f32.mrf.mxu1 }
 0x1fc   : > { %v1128_v27 = vmax.bf16 %v2635_v0, %v1108_v23 }
 0x1fd   : > { %v1005_v28 = vpop.f32.mrf.mxu1 }
 0x1fe   : > { %v1052_v32 = vpack.c.bf16 %v1005_v28, %v1001_v22  ;;  %1412 = vmatprep.mubr.bf16.mxu0 %v1128_v27 }
 0x1ff   : > { %v1007_v33 = vpop.f32.mrf.mxu1  ;;  %1413 = vmatmul.mubr.bf16.gmra.mxu0 %v1127_v30 }
 0x200   : > { %v1053_v34 = vpack.c.bf16 %v1007_v33, %v1003_v25  ;;  %v1109_v35 = vadd.bf16 %v2912_v29, %v1052_v32 }
 0x201   : > { %v1011_v36 = vpop.f32.mrf.mxu1 }
 0x202   : > { %v1110_v37 = vadd.bf16 %v2915_v31, %v1053_v34  ;;  %v1129_v41 = vmax.bf16 %v2635_v0, %v1109_v35 }
 0x203   : > { %v1013_v38 = vpop.f32.mrf.mxu1 }
 0x204   : > { %v1130_v39 = vmax.bf16 %v2635_v0, %v1110_v37 }
 0x205   : > { %v1015_v40 = vpop.f32.mrf.mxu1 }
 0x206   : > { %v1054_v42 = vpack.c.bf16 %v1015_v40, %v1011_v36  ;;  %1422 = vmatprep.mubr.bf16.mxu0 %v1130_v39 }
 0x207   : > { %v1017_v43 = vpop.f32.mrf.mxu1  ;;  %1423 = vmatmul.mubr.bf16.gmra.mxu0 %v1129_v41 }
 0x208   : > { %v1055_v44 = vpack.c.bf16 %v1017_v43, %v1013_v38  ;;  %v1111_v45 = vadd.bf16 %v2912_v29, %v1054_v42 }
 0x209   : > { %v1021_v46 = vpop.f32.mrf.mxu1 }
 0x20a   : > { %v1112_v47 = vadd.bf16 %v2915_v31, %v1055_v44  ;;  %v1131_v51 = vmax.bf16 %v2635_v0, %v1111_v45 }
 0x20b   : > { %v1023_v48 = vpop.f32.mrf.mxu1 }
 0x20c   : > { %v1132_v49 = vmax.bf16 %v2635_v0, %v1112_v47 }
 0x20d   : > { %v1025_v50 = vpop.f32.mrf.mxu1 }
 0x20e   : > { %v1056_v52 = vpack.c.bf16 %v1025_v50, %v1021_v46  ;;  %1432 = vmatprep.mubr.bf16.mxu0 %v1132_v49 }
 0x20f   : > { %v1027_v53 = vpop.f32.mrf.mxu1  ;;  %1433 = vmatmul.mubr.bf16.gmra.mxu0 %v1131_v51 }
 0x210   : > { %v1057_v54 = vpack.c.bf16 %v1027_v53, %v1023_v48  ;;  %v1113_v55 = vadd.bf16 %v2912_v29, %v1056_v52 }
 0x211   : > { %v1031_v56 = vpop.f32.mrf.mxu1 }
 0x212   : > { %v1114_v57 = vadd.bf16 %v2915_v31, %v1057_v54  ;;  %v1133_v61 = vmax.bf16 %v2635_v0, %v1113_v55 }
 0x213   : > { %v1033_v58 = vpop.f32.mrf.mxu1 }
 0x214   : > { %v1134_v59 = vmax.bf16 %v2635_v0, %v1114_v57 }
 0x215   : > { %v1035_v60 = vpop.f32.mrf.mxu1 }
 0x216   : > { %v1058_v62 = vpack.c.bf16 %v1035_v60, %v1031_v56  ;;  %1442 = vmatprep.mubr.bf16.mxu0 %v1134_v59 }
 0x217   : > { %v1037_v63 = vpop.f32.mrf.mxu1  ;;  %1443 = vmatmul.mubr.bf16.gmra.mxu0 %v1133_v61 }
 0x218   : > { %v1059_v2 = vpack.c.bf16 %v1037_v63, %v1033_v58  ;;  %v1115_v4 = vadd.bf16 %v2912_v29, %v1058_v62  ;;  %v2507_v29 = vld [vmem:[%s3124_s7 + $0x40] sm:$0xff]  }
 0x219   : > { %2239 = vmatprep.subr.bf16.mxu0 %v2507_v29  ;;  %2308 = vmatprep.subr.bf16.mxu1 %v2507_v29 }
 0x21a   : > { %v1116_v5 = vadd.bf16 %v2915_v31, %v1059_v2  ;;  %v1135_v26 = vmax.bf16 %v2635_v0, %v1115_v4  ;;  %v2508_v31 = vld [vmem:[%s3124_s7] sm:$0xff]  }
 0x21b   : > { %2240 = vmatpush3.bf16.msra.mxu0 %v2508_v31  ;;  %2316 = vmatpush3.bf16.msra.mxu1 %v2508_v31 }
 0x21c   : > { %v1136_v7 = vmax.bf16 %v2635_v0, %v1116_v5 }
 0x21e   : > { %1452 = vmatprep.mubr.bf16.mxu0 %v1136_v7 }
 0x21f   : > { %1453 = vmatmul.mubr.bf16.gmra.mxu0 %v1135_v26 }
 0x297   : > { %v1364_v13 = vpop.f32.mrf.mxu0 }
 0x299   : > { %v1366_v16 = vpop.f32.mrf.mxu0 }
 0x29b   : > { %v1368_v17 = vpop.f32.mrf.mxu0 }
 0x29c   : > { %v1463_v20 = vpack.c.bf16 %v1368_v17, %v1364_v13 }
 0x29d   : > { %v1370_v22 = vpop.f32.mrf.mxu0 }
 0x29e   : > { %v1464_v23 = vpack.c.bf16 %v1370_v22, %v1366_v16  ;;  %v1520_v25 = vadd.bf16 %v2981_v19, %v1463_v20 }
 0x29f   : > { %v1374_v27 = vpop.f32.mrf.mxu0 }
 0x2a0   : > { %v1521_v28 = vadd.bf16 %v2984_v21, %v1464_v23  ;;  %v1540_v32 = vmax.bf16 %v2635_v0, %v1520_v25 }
 0x2a1   : > { %v1376_v8 = vpop.f32.mrf.mxu0 }
 0x2a2   : > { %v1541_v30 = vmax.bf16 %v2635_v0, %v1521_v28 }
 0x2a3   : > { %v1378_v33 = vpop.f32.mrf.mxu0 }
 0x2a4   : > { %v1465_v34 = vpack.c.bf16 %v1378_v33, %v1374_v27  ;;  %1727 = vmatprep.mubr.bf16.mxu0 %v1541_v30 }
 0x2a5   : > { %v1380_v35 = vpop.f32.mrf.mxu0  ;;  %1728 = vmatmul.mubr.bf16.vlgmr.msra.gmra.mxu0 %v1540_v32 }
 0x2a6   : > { %v1466_v36 = vpack.c.bf16 %v1380_v35, %v1376_v8  ;;  %v1522_v18 = vadd.bf16 %v2981_v19, %v1465_v34 }
 0x2a7   : > { %v1384_v37 = vpop.f32.mrf.mxu0 }
 0x2a8   : > { %v1523_v38 = vadd.bf16 %v2984_v21, %v1466_v36  ;;  %v1542_v42 = vmax.bf16 %v2635_v0, %v1522_v18 }
 0x2a9   : > { %v1386_v39 = vpop.f32.mrf.mxu0 }
 0x2aa   : > { %v1543_v40 = vmax.bf16 %v2635_v0, %v1523_v38 }
 0x2ab   : > { %v1388_v41 = vpop.f32.mrf.mxu0 }
 0x2ac   : > { %v1467_v43 = vpack.c.bf16 %v1388_v41, %v1384_v37  ;;  %1735 = vmatprep.mubr.bf16.mxu0 %v1543_v40 }
 0x2ad   : > { %v1390_v44 = vpop.f32.mrf.mxu0  ;;  %1736 = vmatmul.mubr.bf16.gmra.mxu0 %v1542_v42 }
 0x2ae   : > { %v1468_v45 = vpack.c.bf16 %v1390_v44, %v1386_v39  ;;  %v1524_v46 = vadd.bf16 %v2981_v19, %v1467_v43 }
 0x2af   : > { %v1394_v47 = vpop.f32.mrf.mxu0 }
 0x2b0   : > { %v1525_v48 = vadd.bf16 %v2984_v21, %v1468_v45  ;;  %v1544_v52 = vmax.bf16 %v2635_v0, %v1524_v46 }
 0x2b1   : > { %v1396_v49 = vpop.f32.mrf.mxu0 }
 0x2b2   : > { %v1545_v50 = vmax.bf16 %v2635_v0, %v1525_v48 }
 0x2b3   : > { %v1398_v51 = vpop.f32.mrf.mxu0 }
 0x2b4   : > { %v1469_v53 = vpack.c.bf16 %v1398_v51, %v1394_v47  ;;  %1743 = vmatprep.mubr.bf16.mxu0 %v1545_v50 }
 0x2b5   : > { %v1400_v54 = vpop.f32.mrf.mxu0  ;;  %1744 = vmatmul.mubr.bf16.gmra.mxu0 %v1544_v52 }
 0x2b6   : > { %v1470_v55 = vpack.c.bf16 %v1400_v54, %v1396_v49  ;;  %v1526_v56 = vadd.bf16 %v2981_v19, %v1469_v53 }
 0x2b7   : > { %v1404_v57 = vpop.f32.mrf.mxu0 }
 0x2b8   : > { %v1527_v58 = vadd.bf16 %v2984_v21, %v1470_v55  ;;  %v1546_v61 = vmax.bf16 %v2635_v0, %v1526_v56 }
 0x2b9   : > { %v1406_v59 = vpop.f32.mrf.mxu0 }
 0x2ba   : > { %v1547_v60 = vmax.bf16 %v2635_v0, %v1527_v58 }
 0x2bb   : > { %v1408_v62 = vpop.f32.mrf.mxu0 }
 0x2bc   : > { %v1471_v63 = vpack.c.bf16 %v1408_v62, %v1404_v57  ;;  %1751 = vmatprep.mubr.bf16.mxu1 %v1547_v60 }
 0x2bd   : > { %v1410_v1 = vpop.f32.mrf.mxu0  ;;  %1752 = vmatmul.mubr.bf16.vlgmr.msra.gmra.mxu1 %v1546_v61 }
 0x2be   : > { %v1472_v2 = vpack.c.bf16 %v1410_v1, %v1406_v59  ;;  %v1528_v3 = vadd.bf16 %v2981_v19, %v1471_v63  ;;  %v3030_v63 = vld [vmem:[%s3125_s8] ss:$0 sm:$0xff] }
 0x2bf   : > { %v1414_v4 = vpop.f32.mrf.mxu0 }
 0x2c0   : > { %v1529_v5 = vadd.bf16 %v2984_v21, %v1472_v2  ;;  %v1548_v26 = vmax.bf16 %v2635_v0, %v1528_v3 }
 0x2c1   : > { %v1416_v6 = vpop.f32.mrf.mxu0 }
 0x2c2   : > { %v1549_v7 = vmax.bf16 %v2635_v0, %v1529_v5 }
 0x2c3   : > { %v1418_v24 = vpop.f32.mrf.mxu0 }
 0x2c4   : > { %v1473_v29 = vpack.c.bf16 %v1418_v24, %v1414_v4  ;;  %1759 = vmatprep.mubr.bf16.mxu1 %v1549_v7 }
 0x2c5   : > { %v1420_v31 = vpop.f32.mrf.mxu0  ;;  %1760 = vmatmul.mubr.bf16.gmra.mxu1 %v1548_v26 }
 0x2c6   : > { %v1474_v9 = vpack.c.bf16 %v1420_v31, %v1416_v6  ;;  %v1530_v10 = vadd.bf16 %v2981_v19, %v1473_v29 }
 0x2c7   : > { %v1424_v11 = vpop.f32.mrf.mxu0 }
 0x2c8   : > { %v1531_v12 = vadd.bf16 %v2984_v21, %v1474_v9  ;;  %v1550_v16 = vmax.bf16 %v2635_v0, %v1530_v10 }
 0x2c9   : > { %v1426_v13 = vpop.f32.mrf.mxu0 }
 0x2ca   : > { %v1551_v14 = vmax.bf16 %v2635_v0, %v1531_v12 }
 0x2cb   : > { %v1428_v15 = vpop.f32.mrf.mxu0 }
 0x2cc   : > { %v1475_v17 = vpack.c.bf16 %v1428_v15, %v1424_v11  ;;  %1767 = vmatprep.mubr.bf16.mxu1 %v1551_v14 }
 0x2cd   : > { %v1430_v20 = vpop.f32.mrf.mxu0  ;;  %1768 = vmatmul.mubr.bf16.gmra.mxu1 %v1550_v16 }
 0x2ce   : > { %v1476_v22 = vpack.c.bf16 %v1430_v20, %v1426_v13  ;;  %v1532_v23 = vadd.bf16 %v2981_v19, %v1475_v17 }
 0x2cf   : > { %v1434_v25 = vpop.f32.mrf.mxu0 }
 0x2d0   : > { %v1533_v27 = vadd.bf16 %v2984_v21, %v1476_v22  ;;  %v1552_v32 = vmax.bf16 %v2635_v0, %v1532_v23 }
 0x2d1   : > { %v1436_v28 = vpop.f32.mrf.mxu0 }
 0x2d2   : > { %v1553_v8 = vmax.bf16 %v2635_v0, %v1533_v27 }
 0x2d3   : > { %v1438_v30 = vpop.f32.mrf.mxu0 }
 0x2d4   : > { %v1477_v33 = vpack.c.bf16 %v1438_v30, %v1434_v25  ;;  %1775 = vmatprep.mubr.bf16.mxu1 %v1553_v8 }
 0x2d5   : > { %v1440_v34 = vpop.f32.mrf.mxu0  ;;  %1776 = vmatmul.mubr.bf16.gmra.mxu1 %v1552_v32 }
 0x2d6   : > { %v1478_v35 = vpack.c.bf16 %v1440_v34, %v1436_v28  ;;  %v1534_v36 = vadd.bf16 %v2981_v19, %v1477_v33 }
 0x2d7   : > { %v1444_v18 = vpop.f32.mrf.mxu0 }
 0x2d8   : > { %v1535_v37 = vadd.bf16 %v2984_v21, %v1478_v35  ;;  %v1554_v41 = vmax.bf16 %v2635_v0, %v1534_v36 }
 0x2d9   : > { %v1446_v38 = vpop.f32.mrf.mxu0 }
 0x2da   : > { %v1555_v39 = vmax.bf16 %v2635_v0, %v1535_v37 }
 0x2db   : > { %v1448_v40 = vpop.f32.mrf.mxu0 }
 0x2dc   : > { %v1479_v42 = vpack.c.bf16 %v1448_v40, %v1444_v18  ;;  %1783 = vmatprep.mubr.bf16.mxu1 %v1555_v39 }
 0x2dd   : > { %v1450_v43 = vpop.f32.mrf.mxu0  ;;  %1784 = vmatmul.mubr.bf16.gmra.mxu1 %v1554_v41 }
 0x2de   : > { %v1480_v44 = vpack.c.bf16 %v1450_v43, %v1446_v38  ;;  %v1536_v45 = vadd.bf16 %v2981_v19, %v1479_v42 }
 0x2df   : > { %v1454_v46 = vpop.f32.mrf.mxu0 }
 0x2e0   : > { %v1537_v47 = vadd.bf16 %v2984_v21, %v1480_v44  ;;  %v1556_v51 = vmax.bf16 %v2635_v0, %v1536_v45 }
 0x2e1   : > { %v1456_v48 = vpop.f32.mrf.mxu0 }
 0x2e2   : > { %v1557_v49 = vmax.bf16 %v2635_v0, %v1537_v47 }
 0x2e3   : > { %v1458_v50 = vpop.f32.mrf.mxu0 }
 0x2e4   : > { %v1481_v52 = vpack.c.bf16 %v1458_v50, %v1454_v46  ;;  %1791 = vmatprep.mubr.bf16.mxu1 %v1557_v49 }
 0x2e5   : > { %v1460_v53 = vpop.f32.mrf.mxu0  ;;  %1792 = vmatmul.mubr.bf16.gmra.mxu1 %v1556_v51 }
 0x2e6   : > { %v1482_v54 = vpack.c.bf16 %v1460_v53, %v1456_v48  ;;  %v1538_v55 = vadd.bf16 %v2981_v19, %v1481_v52 }
 0x2e8   : > { %v1539_v56 = vadd.bf16 %v2984_v21, %v1482_v54  ;;  %v1558_v58 = vmax.bf16 %v2635_v0, %v1538_v55 }
 0x2ea   : > { %v1559_v57 = vmax.bf16 %v2635_v0, %v1539_v56 }
 0x2ec   : > { %1799 = vmatprep.mubr.bf16.mxu1 %v1559_v57 }
 0x2ed   : > { %1800 = vmatmul.mubr.bf16.gmra.mxu1 %v1558_v58 }
 0x365   : > { %v2241_v59 = vpop.f32.mrf.mxu0 }
 0x367   : > { %v2242_v60 = vpop.f32.mrf.mxu0 }
 0x368   : > { %v2243_v62 = vadd.f32 %v2242_v60, %v2241_v59 }
 0x369   : > { %v2244_v61 = vpop.f32.mrf.mxu0 }
 0x36a   : > { %v1730_v2 = vadd.f32 %v2243_v62, %v3030_v63 }
 0x36b   : > { %v2245_v19 = vpop.f32.mrf.mxu0 }
 0x36c   : > { %v2246_v21 = vadd.f32 %v2245_v19, %v2244_v61 }
 0x36d   : > { %v2247_v1 = vpop.f32.mrf.mxu0 }
 0x36e   : > { %v1733_v0 = vadd.f32 %v2246_v21, %v3030_v63 }
 0x36f   : > { %v2248_v3 = vpop.f32.mrf.mxu0 }
 0x370   : > { %v2169_v4 = vpack.c.bf16 %v1733_v0, %v1730_v2  ;;  %v2249_v6 = vadd.f32 %v2248_v3, %v2247_v1 }
 0x371   : > { %v2250_v5 = vpop.f32.mrf.mxu0 }
 0x372   : > { %2170 = vst [vmem:[%s3036_s26] sm:$0xff] %v2169_v4   ;;  %v1738_v29 = vadd.f32 %v2249_v6, %v3030_v63 }
 0x373   : > { %v2251_v7 = vpop.f32.mrf.mxu0 }
 0x374   : > { %v2252_v24 = vadd.f32 %v2251_v7, %v2250_v5 }
 0x375   : > { %v2253_v26 = vpop.f32.mrf.mxu0 }
 0x376   : > { %v1741_v31 = vadd.f32 %v2252_v24, %v3030_v63 }
 0x377   : > { %v2254_v9 = vpop.f32.mrf.mxu0 }
 0x378   : > { %v2174_v10 = vpack.c.bf16 %v1741_v31, %v1738_v29  ;;  %v2255_v12 = vadd.f32 %v2254_v9, %v2253_v26 }
 0x379   : > { %v2256_v11 = vpop.f32.mrf.mxu0 }
 0x37a   : > { %2216 = vst [vmem:[%s3036_s26 + $0x8] sm:$0xff] %v2174_v10   ;;  %v1746_v16 = vadd.f32 %v2255_v12, %v3030_v63 }
 0x37b   : > { %v2257_v13 = vpop.f32.mrf.mxu0 }
 0x37c   : > { %v2258_v14 = vadd.f32 %v2257_v13, %v2256_v11 }
 0x37d   : > { %v2259_v15 = vpop.f32.mrf.mxu1 }
 0x37e   : > { %v1749_v17 = vadd.f32 %v2258_v14, %v3030_v63 }
 0x37f   : > { %v2260_v20 = vpop.f32.mrf.mxu1 }
 0x380   : > { %v2179_v22 = vpack.c.bf16 %v1749_v17, %v1746_v16  ;;  %v2261_v25 = vadd.f32 %v2260_v20, %v2259_v15 }
 0x381   : > { %v2262_v23 = vpop.f32.mrf.mxu1 }
 0x382   : > { %2217 = vst [vmem:[%s3036_s26 + $0x10] sm:$0xff] %v2179_v22   ;;  %v1754_v30 = vadd.f32 %v2261_v25, %v3030_v63 }
 0x383   : > { %v2263_v27 = vpop.f32.mrf.mxu1 }
 0x384   : > { %v2264_v28 = vadd.f32 %v2263_v27, %v2262_v23 }
 0x385   : > { %v2265_v8 = vpop.f32.mrf.mxu1 }
 0x386   : > { %v1757_v32 = vadd.f32 %v2264_v28, %v3030_v63 }
 0x387   : > { %v2266_v33 = vpop.f32.mrf.mxu1 }
 0x388   : > { %v2184_v34 = vpack.c.bf16 %v1757_v32, %v1754_v30  ;;  %v2267_v36 = vadd.f32 %v2266_v33, %v2265_v8 }
 0x389   : > { %v2268_v35 = vpop.f32.mrf.mxu1 }
 0x38a   : > { %2218 = vst [vmem:[%s3036_s26 + $0x18] sm:$0xff] %v2184_v34   ;;  %v1762_v39 = vadd.f32 %v2267_v36, %v3030_v63 }
 0x38b   : > { %v2269_v18 = vpop.f32.mrf.mxu1 }
 0x38c   : > { %v2270_v37 = vadd.f32 %v2269_v18, %v2268_v35 }
 0x38d   : > { %v2271_v38 = vpop.f32.mrf.mxu1 }
 0x38e   : > { %v1765_v40 = vadd.f32 %v2270_v37, %v3030_v63 }
 0x38f   : > { %v2272_v41 = vpop.f32.mrf.mxu1 }
 0x390   : > { %v2189_v42 = vpack.c.bf16 %v1765_v40, %v1762_v39  ;;  %v2273_v44 = vadd.f32 %v2272_v41, %v2271_v38 }
 0x391   : > { %v2274_v43 = vpop.f32.mrf.mxu1 }
 0x392   : > { %2219 = vst [vmem:[%s3036_s26 + $0x20] sm:$0xff] %v2189_v42   ;;  %v1770_v48 = vadd.f32 %v2273_v44, %v3030_v63 }
 0x393   : > { %v2275_v45 = vpop.f32.mrf.mxu1 }
 0x394   : > { %v2276_v46 = vadd.f32 %v2275_v45, %v2274_v43 }
 0x395   : > { %v2277_v47 = vpop.f32.mrf.mxu1 }
 0x396   : > { %v1773_v49 = vadd.f32 %v2276_v46, %v3030_v63 }
 0x397   : > { %v2278_v50 = vpop.f32.mrf.mxu1 }
 0x398   : > { %v2194_v51 = vpack.c.bf16 %v1773_v49, %v1770_v48  ;;  %v2279_v53 = vadd.f32 %v2278_v50, %v2277_v47 }
 0x399   : > { %v2280_v52 = vpop.f32.mrf.mxu1 }
 0x39a   : > { %2220 = vst [vmem:[%s3036_s26 + $0x28] sm:$0xff] %v2194_v51   ;;  %v1778_v57 = vadd.f32 %v2279_v53, %v3030_v63 }
 0x39b   : > { %v2281_v54 = vpop.f32.mrf.mxu1 }
 0x39c   : > { %v2282_v55 = vadd.f32 %v2281_v54, %v2280_v52 }
 0x39d   : > { %v2283_v56 = vpop.f32.mrf.mxu1 }
 0x39e   : > { %v1781_v58 = vadd.f32 %v2282_v55, %v3030_v63 }
 0x39f   : > { %v2284_v59 = vpop.f32.mrf.mxu1 }
 0x3a0   : > { %v2199_v60 = vpack.c.bf16 %v1781_v58, %v1778_v57  ;;  %v2285_v62 = vadd.f32 %v2284_v59, %v2283_v56 }
 0x3a1   : > { %v2286_v61 = vpop.f32.mrf.mxu1 }
 0x3a2   : > { %2221 = vst [vmem:[%s3036_s26 + $0x30] sm:$0xff] %v2199_v60   ;;  %v1786_v2 = vadd.f32 %v2285_v62, %v3030_v63 }
 0x3a3   : > { %v2287_v19 = vpop.f32.mrf.mxu1 }
 0x3a4   : > { %v2288_v21 = vadd.f32 %v2287_v19, %v2286_v61 }
 0x3a5   : > { %v2289_v1 = vpop.f32.mrf.mxu1 }
 0x3a6   : > { %v1789_v0 = vadd.f32 %v2288_v21, %v3030_v63 }
 0x3a7   : > { %v2290_v3 = vpop.f32.mrf.mxu1 }
 0x3a8   : > { %v2204_v4 = vpack.c.bf16 %v1789_v0, %v1786_v2  ;;  %v2291_v6 = vadd.f32 %v2290_v3, %v2289_v1 }
 0x3a9   : > { %v2292_v5 = vpop.f32.mrf.mxu1 }
 0x3aa   : > { %2222 = vst [vmem:[%s3036_s26 + $0x38] sm:$0xff] %v2204_v4   ;;  %v1794_v29 = vadd.f32 %v2291_v6, %v3030_v63 }
 0x3ab   : > { %v2293_v7 = vpop.f32.mrf.mxu1 }
 0x3ac   : > { %v2294_v24 = vadd.f32 %v2293_v7, %v2292_v5 }
 0x3ad   : > { %v2295_v26 = vpop.f32.mrf.mxu1 }
 0x3ae   : > { %v1797_v31 = vadd.f32 %v2294_v24, %v3030_v63 }
 0x3af   : > { %v2296_v9 = vpop.f32.mrf.mxu1 }
 0x3b0   : > { %v2209_v10 = vpack.c.bf16 %v1797_v31, %v1794_v29  ;;  %v2297_v12 = vadd.f32 %v2296_v9, %v2295_v26 }
 0x3b1   : > { %v2298_v11 = vpop.f32.mrf.mxu1 }
 0x3b2   : > { %2223 = vst [vmem:[%s3036_s26 + $0x40] sm:$0xff] %v2209_v10   ;;  %v1802_v15 = vadd.f32 %v2297_v12, %v3030_v63 }
 0x3b3   : > { %v2299_v13 = vpop.f32.mrf.mxu1 }
 0x3b4   : > { %v2300_v14 = vadd.f32 %v2299_v13, %v2298_v11 }
 0x3b6   : > { %v1805_v16 = vadd.f32 %v2300_v14, %v3030_v63 }
 0x3b8   : > { %v2214_v17 = vpack.c.bf16 %v1805_v16, %v1802_v15 }
 0x3ba   : > { %2224 = vst [vmem:[%s3036_s26 + $0x48] sm:$0xff] %v2214_v17  }
 0x3bb   : > { %2574 = shalt.err (!%p2571_p3)
}
 0x3bc   : > { %s2575_s25 = scalar_lea.hbm %s3070_s16, 1280  ;;  %s2579_s27 = scalar_lea.hbm %s3126_s9, 2560 }
 0x3bd   : > { %p2576_p2 = scmp.ne.s32.totalorder %s3070_s16, %s2575_s25  ;;  %p2580_p7 = scmp.lt.s32.totalorder %s3070_s16, %s3126_s9 }
 0x3be   : > { %p2581_p6 = scmp.lt.s32.totalorder %s2579_s27, %s2575_s25 }
 0x3bf   : > { %p2577_p4 = pnand %p2576_p2, %p2728_p5 }
 0x3c0   : > { %p2582_p9 = por %p2581_p6, %p2580_p7 }
 0x3c1   : > { %p2578_p13 = pneg %p2577_p4 }
 0x3c3   : > { %p2583_p10 = pnand %p2582_p9, %p2578_p13 }
 0x3c5   : > { %2586 = shalt.err (!%p2583_p10)
}
 0x3c6   : > { %s2638_s17 = smov 64   ;;  %s2639_s22 = smov 4  }
 0x3c7   : > { %2326 = dma.vmem_to_hbm [thread:$0]  (%p2728_p5), %s3072_s28, 1280, %s3070_s16, %s3077_s13, %s2638_s17, %s2638_s17, %s2639_s22  }
 0x3c8 PF: > { %p2343_p12 = scmp.ge.s32.totalorder %s2629_s12, 2  ;;  %s1937_s23 = sand.u32 1, %s2617_s30  }
 0x3c9   : > { %p3136_p8 = scmp.ne.s32.totalorder %s3129_s20, 0  ;;  %s1938_s21 = scalar_lea.sflag [#allocation4], %s1937_s23 }
 0x3cb   : > { %p2336_p11 = pnand %p2343_p12, %p3136_p8 }
 0x3cd   : > { %p2337_p0 = pneg %p2336_p11 }
 0x3cf   : > { %2612 = dma.done.wait (%p2337_p0), %s1938_s21, 1280  }
 0x3d0   : > { %2614 = vsyncadd (%p2337_p0), %s1938_s21, 4294966016  ;;  %p21_p1 = scmp.ge.s32.totalorder %s2715_s15, 4   ;;  %s3137_s30 = smov %s2621_s10 }
 0x3d1   : > { %s3138_s10 = smov %s2625_s11  ;;  %s3139_s11 = smov %s2726_s18 }
 0x3d2   : > { %s3140_s12 = smov %s2715_s15  ;;  %23 = sbr.rel (!%p21_p1) target bundleno = 5 (0x5), region = 100 }
 0x3d7   :  { %1943 = vsyncpa [#allocation3], 1 }
 0x3d8   :  { %1945 = vsyncpa [#allocation3 + $0x1], 1 }
 0x3d9   :  { %1946 = vsyncpa [#allocation6], 1 }
 0x3da   :  { %1947 = vsyncpa [#allocation4], 1 }
 0x3db   :  { %1949 = vsyncpa [#allocation4 + $0x1], 1 }

</bundles_post_ra>
